<compile_context>
chip_gen: v6e
topology: v6e:2x2x1
jax: 0.10.0
libtpu: 0.0.40
codegen_flags: <defaults>
</compile_context>

<pallas_src>
import numpy as np

import jax
import jax.numpy as jnp
from jax.experimental import pallas as pl


# ---------------------------------------------------------------------------
# The fused kernel: conv1 patches + state + all weights in, padded action out.
# ---------------------------------------------------------------------------
def _bc_policy_kernel(
    patches1_ref, state_ref,
    w1_ref, b1_ref,
    g2_ref, w2_ref, b2_ref,
    g3_ref, w3_ref, b3_ref,
    wfc_ref, bfc_ref,
    wm1_ref, bm1_ref, wm2_ref, bm2_ref,
    wp1i_ref, wp1s_ref, bp1_ref,
    wp2_ref, bp2_ref,
    out_ref,
):
    f32, bf16 = jnp.float32, jnp.bfloat16

    # ---- conv1: im2col already done in the wrapper -> a single MXU matmul.
    a = jnp.dot(patches1_ref[...], w1_ref[...], preferred_element_type=f32)
    x = jnp.maximum(a + b1_ref[...], 0.0)                      # (N*H1*W1, 32) f32

    # ---- conv2 / conv3: gather 9 taps with tiny 0/1 matrices, concat along
    #      lanes, ONE matmul against the vstacked (9*Cin, Cout) weight.
    def conv_relu(x_f32, g_ref, wcat_ref, b_ref):
        x_b = x_f32.astype(bf16)
        taps = [jnp.dot(g_ref[t], x_b, preferred_element_type=f32)
                for t in range(g_ref.shape[0])]                # 9 x (rows_out, Cin)
        patches = jnp.concatenate(taps, axis=-1).astype(bf16)  # (rows_out, 9*Cin)
        acc = jnp.dot(patches, wcat_ref[...], preferred_element_type=f32)
        return jnp.maximum(acc + b_ref[...], 0.0)              # f32

    x = conv_relu(x, g2_ref, w2_ref, b2_ref)                   # (N*H2*W2, 64)
    x = conv_relu(x, g3_ref, w3_ref, b3_ref)                   # (N*H3*W3, 128)

    # ---- flatten (PyTorch NCHW channel-major order folded into wfc host-side)
    #      then Linear + ReLU as a single (N, 512) @ (512, 256) matmul.
    n_batch = out_ref.shape[0]
    img_flat = x.reshape(n_batch, -1).astype(bf16)             # (N, P3*128)
    h = jnp.dot(img_flat, wfc_ref[...], preferred_element_type=f32)
    img_emb = jnp.maximum(h + bfc_ref[...], 0.0)               # (N, 256) f32

    # ---- MLP encoder on the low-dim state (K padded to 16 host-side).
    h = jnp.dot(state_ref[...], wm1_ref[...], preferred_element_type=f32)
    h = jnp.maximum(h + bm1_ref[...], 0.0)
    h = jnp.dot(h.astype(bf16), wm2_ref[...], preferred_element_type=f32)
    state_emb = jnp.maximum(h + bm2_ref[...], 0.0)             # (N, 128) f32

    # ---- policy head: torch.cat folded away by splitting pol1's weight.
    h = jnp.dot(img_emb.astype(bf16), wp1i_ref[...], preferred_element_type=f32)
    h = h + jnp.dot(state_emb.astype(bf16), wp1s_ref[...],
                    preferred_element_type=f32)
    h = jnp.maximum(h + bp1_ref[...], 0.0)                     # (N, 512) f32
    a = jnp.dot(h.astype(bf16), wp2_ref[...], preferred_element_type=f32)
    out_ref[...] = jnp.tanh(a + bp2_ref[...])                  # (N, 128) lane-dense


# ---------------------------------------------------------------------------
# Host-side constant construction (one-time, at parameter-prep time)
# ---------------------------------------------------------------------------
def _conv_tap_gathers(n_batch, h_in, w_in, h_out, w_out, k=3, stride=2, pad=1):
    """0/1 gather matrices: G[t] @ X picks, per output pixel, the input value
    under kernel tap t (zero where the tap lies in the zero padding).
    Row orders: output rows (n, ho, wo); input rows (n, hi, wi)."""
    rows_out = n_batch * h_out * w_out
    rows_in = n_batch * h_in * w_in
    g = np.zeros((k * k, rows_out, rows_in), dtype=np.float32)
    for n in range(n_batch):
        for ho in range(h_out):
            for wo in range(w_out):
                r = (n * h_out + ho) * w_out + wo
                for i in range(k):
                    for j in range(k):
                        hi = stride * ho - pad + i
                        wi = stride * wo - pad + j
                        if 0 <= hi < h_in and 0 <= wi < w_in:
                            g[i * k + j, r, (n * h_in + hi) * w_in + wi] = 1.0
    return g


def make_params(key, image_channels=3, low_dim_state_dim=10, action_dim=4,
                image_size=(16, 16)):
    """Synthetic parameters in PyTorch layout (conv OIHW; linear stored as
    (in, out) so that y = x @ w + b; cnn_fc_w rows indexed by NCHW flatten)."""
    H, W = image_size
    flattened = 128 * (H // 8) * (W // 8)   # three stride-2 convs

    def normal(k, shape, scale=0.1):
        return scale * jax.random.normal(k, shape, dtype=jnp.float32)

    ks = jax.random.split(key, 16)
    return {
        "conv1_w": normal(ks[0], (32, image_channels, 3, 3)),
        "conv1_b": normal(ks[1], (32,)),
        "conv2_w": normal(ks[2], (64, 32, 3, 3)),
        "conv2_b": normal(ks[3], (64,)),
        "conv3_w": normal(ks[4], (128, 64, 3, 3)),
        "conv3_b": normal(ks[5], (128,)),
        "cnn_fc_w": normal(ks[6], (flattened, 256)),
        "cnn_fc_b": normal(ks[7], (256,)),
        "mlp1_w": normal(ks[8], (low_dim_state_dim, 256)),
        "mlp1_b": normal(ks[9], (256,)),
        "mlp2_w": normal(ks[10], (256, 128)),
        "mlp2_b": normal(ks[11], (128,)),
        "pol1_w": normal(ks[12], (256 + 128, 512)),
        "pol1_b": normal(ks[13], (512,)),
        "pol2_w": normal(ks[14], (512, action_dim)),
        "pol2_b": normal(ks[15], (action_dim,)),
    }


def prepare_kernel_inputs(params, *, batch, image_channels, image_size,
                          action_dim):
    """One-time host-side conversion of PyTorch-layout params into the fused
    kernel's operand set (vstacked per-conv weights, small gather matrices for
    conv2/3, flattened+permuted fc weight, split/zero-padded policy weights)."""
    H, W = image_size
    H1, W1 = H // 2, W // 2
    H2, W2 = H1 // 2, W1 // 2
    H3, W3 = H2 // 2, W2 // 2
    P3 = H3 * W3
    bf16, f32 = jnp.bfloat16, jnp.float32

    def vstack_taps(w, pad_k_to=None):
        # (O, Cin, 3, 3) -> (9*Cin, O); row index = t*Cin + c with t = 3*i + j.
        w = np.asarray(w, np.float32)
        o, cin, k, _ = w.shape
        wv = np.transpose(w, (2, 3, 1, 0)).reshape(k * k * cin, o)
        if pad_k_to is not None and pad_k_to > wv.shape[0]:
            wv = np.concatenate(
                [wv, np.zeros((pad_k_to - wv.shape[0], o), np.float32)], axis=0)
        return jnp.asarray(wv, bf16)

    def bias(b, pad_to=None):
        b = np.asarray(b, np.float32)
        if pad_to is not None and pad_to > b.shape[0]:
            b = np.concatenate([b, np.zeros((pad_to - b.shape[0],), np.float32)])
        return jnp.asarray(b[None, :], f32)

    # conv1: K = 9*image_channels, padded to match the wrapper-side im2col pad.
    k1 = 9 * image_channels
    k1_pad = ((k1 + 31) // 32) * 32
    w1 = vstack_taps(params["conv1_w"], pad_k_to=k1_pad)

    # conv2 / conv3 keep (tiny) 0/1 gather matrices in-kernel.
    g2 = jnp.asarray(_conv_tap_gathers(batch, H1, W1, H2, W2), bf16)
    g3 = jnp.asarray(_conv_tap_gathers(batch, H2, W2, H3, W3), bf16)
    w2 = vstack_taps(params["conv2_w"])
    w3 = vstack_taps(params["conv3_w"])

    # cnn fc: permute rows from PyTorch NCHW flatten order (c*P3 + p) to the
    # kernel's in-register layout (p*128 + c), flattened to a single 2-D weight.
    wfc = np.asarray(params["cnn_fc_w"], np.float32)            # (128*P3, 256)
    wfc = wfc.reshape(128, P3, wfc.shape[1]).transpose(1, 0, 2).reshape(
        P3 * 128, wfc.shape[-1])
    wfc = jnp.asarray(wfc, bf16)

    # MLP encoder: pad the K=low_dim_state_dim contraction dim to 16.
    wm1 = np.asarray(params["mlp1_w"], np.float32)
    state_k = wm1.shape[0]
    state_k_pad = ((state_k + 15) // 16) * 16
    wm1 = np.concatenate(
        [wm1, np.zeros((state_k_pad - state_k, wm1.shape[1]), np.float32)],
        axis=0)

    # policy head: split pol1 (concat fold); zero-pad pol2 to 128 output lanes.
    wp1 = np.asarray(params["pol1_w"], np.float32)              # (384, 512)
    wp2 = np.asarray(params["pol2_w"], np.float32)              # (512, action_dim)
    pad_n = ((action_dim + 127) // 128) * 128
    wp2_pad = np.zeros((wp2.shape[0], pad_n), np.float32)
    wp2_pad[:, :action_dim] = wp2

    operands = (
        w1, bias(params["conv1_b"]),
        g2, w2, bias(params["conv2_b"]),
        g3, w3, bias(params["conv3_b"]),
        wfc, bias(params["cnn_fc_b"]),
        jnp.asarray(wm1, bf16), bias(params["mlp1_b"]),
        jnp.asarray(params["mlp2_w"], bf16), bias(params["mlp2_b"]),
        jnp.asarray(wp1[:256], bf16), jnp.asarray(wp1[256:], bf16),
        bias(params["pol1_b"]),
        jnp.asarray(wp2_pad, bf16), bias(params["pol2_b"], pad_to=pad_n),
    )

    rows1, rows2, rows3 = batch * H1 * W1, batch * H2 * W2, batch * H3 * W3
    macs = (
        rows1 * k1_pad * 32
        + 9 * rows2 * rows1 * 32 + rows2 * (9 * 32) * 64
        + 9 * rows3 * rows2 * 64 + rows3 * (9 * 64) * 128
        + batch * (P3 * 128) * 256
        + batch * state_k_pad * 256 + batch * 256 * 128
        + batch * 256 * 512 + batch * 128 * 512
        + batch * 512 * pad_n
    )
    meta = dict(pad_n=pad_n, k1_pad=k1_pad, state_k_pad=state_k_pad,
                flops=2 * macs, transcendentals=batch * pad_n)
    return operands, meta


# ---------------------------------------------------------------------------
# Forward wrapper: one pallas_call for the entire policy
# ---------------------------------------------------------------------------
def _im2col_conv1(image_nchw, k=3, stride=2, pad=1, pad_cols_to=None):
    """Channels-last im2col of the raw image in plain XLA (fused by XLA with the
    surrounding glue). Rows ordered (n, ho, wo); columns ordered (tap, cin)."""
    n, c, h, w = image_nchw.shape
    h_out = (h + 2 * pad - k) // stride + 1
    w_out = (w + 2 * pad - k) // stride + 1
    xp = jnp.pad(image_nchw, ((0, 0), (0, 0), (pad, pad), (pad, pad)))
    cols = []
    for i in range(k):
        for j in range(k):
            cols.append(xp[:, :, i:i + stride * (h_out - 1) + 1:stride,
                               j:j + stride * (w_out - 1) + 1:stride])
    patches = jnp.stack(cols, axis=1)                  # (N, 9, C, Ho, Wo)
    patches = patches.transpose(0, 3, 4, 1, 2)         # (N, Ho, Wo, 9, C)
    patches = patches.reshape(n * h_out * w_out, k * k * c)
    if pad_cols_to is not None and pad_cols_to > patches.shape[1]:
        patches = jnp.pad(patches, ((0, 0), (0, pad_cols_to - patches.shape[1])))
    return patches


def _full_spec(shape):
    nd = len(shape)
    return pl.BlockSpec(shape, lambda *_: (0,) * nd)


def bc_policy_forward(operands, meta, image, low_dim_state, *, action_dim):
    n = image.shape[0]
    pad_n = meta["pad_n"]

    patches1 = _im2col_conv1(image, pad_cols_to=meta["k1_pad"]).astype(jnp.bfloat16)
    state = low_dim_state
    if meta["state_k_pad"] > state.shape[1]:
        state = jnp.pad(state, ((0, 0), (0, meta["state_k_pad"] - state.shape[1])))
    state = state.astype(jnp.bfloat16)

    args = (patches1, state) + tuple(operands)
    bytes_accessed = sum(int(a.size) * a.dtype.itemsize for a in args)
    bytes_accessed += n * pad_n * 4
    cost = pl.CostEstimate(flops=int(meta["flops"]),
                           transcendentals=int(meta["transcendentals"]),
                           bytes_accessed=int(bytes_accessed))

    out = pl.pallas_call(
        _bc_policy_kernel,
        out_shape=jax.ShapeDtypeStruct((n, pad_n), jnp.float32),
        in_specs=[_full_spec(a.shape) for a in args],
        out_specs=pl.BlockSpec((n, pad_n), lambda *_: (0, 0)),
        cost_estimate=cost,
    )(*args)
    return out[:, :action_dim]


# ---------------------------------------------------------------------------
# Pure-JAX reference (mirrors the PyTorch module) for a correctness check
# ---------------------------------------------------------------------------
def _reference_forward(params, image, low_dim_state):
    x = image
    for i in (1, 2, 3):
        w, b = params[f"conv{i}_w"], params[f"conv{i}_b"]
        x = jax.lax.conv_general_dilated(
            x, w, window_strides=(2, 2), padding=((1, 1), (1, 1)),
            dimension_numbers=("NCHW", "OIHW", "NCHW"))
        x = jnp.maximum(x + b[None, :, None, None], 0.0)
    x = x.reshape(x.shape[0], -1)                  # NCHW channel-major flatten
    img = jnp.maximum(x @ params["cnn_fc_w"] + params["cnn_fc_b"], 0.0)
    s = jnp.maximum(low_dim_state @ params["mlp1_w"] + params["mlp1_b"], 0.0)
    s = jnp.maximum(s @ params["mlp2_w"] + params["mlp2_b"], 0.0)
    f = jnp.concatenate([img, s], axis=-1)
    hh = jnp.maximum(f @ params["pol1_w"] + params["pol1_b"], 0.0)
    return jnp.tanh(hh @ params["pol2_w"] + params["pol2_b"])


if __name__ == "__main__":
    key = jax.random.PRNGKey(0)
    k_img, k_state, k_params = jax.random.split(key, 3)

    batch = 2
    image_channels = 3
    image_size = (16, 16)     # small; divisible by 8 (three stride-2 convs)
    low_dim_state_dim = 10
    action_dim = 4

    image = jax.random.normal(k_img, (batch, image_channels, *image_size),
                              dtype=jnp.float32)
    low_dim_state = jax.random.normal(k_state, (batch, low_dim_state_dim),
                                      dtype=jnp.float32)

    params = make_params(k_params, image_channels, low_dim_state_dim,
                         action_dim, image_size)
    operands, meta = prepare_kernel_inputs(
        params, batch=batch, image_channels=image_channels,
        image_size=image_size, action_dim=action_dim)

    out = bc_policy_forward(operands, meta, image, low_dim_state,
                            action_dim=action_dim)
    out = jax.block_until_ready(out)
    assert out.shape == (batch, action_dim), out.shape
    assert bool(jnp.all(jnp.isfinite(out)))

    ref = _reference_forward(params, image, low_dim_state)
    assert bool(jnp.allclose(out, ref, atol=5e-2, rtol=5e-2)), (
        float(jnp.max(jnp.abs(out - ref))))
    print("KERNEL_OK")
</pallas_src>

<mosaic_0001>
module attributes {stable_mosaic.version = 11 : i64} {
  func.func @_bc_policy_kernel(%arg0: memref<128x32xbf16, #tpu.memory_space<vmem>>, %arg1: memref<2x16xbf16, #tpu.memory_space<vmem>>, %arg2: memref<32x32xbf16, #tpu.memory_space<vmem>>, %arg3: memref<1x32xf32, #tpu.memory_space<vmem>>, %arg4: memref<9x32x128xbf16, #tpu.memory_space<vmem>>, %arg5: memref<288x64xbf16, #tpu.memory_space<vmem>>, %arg6: memref<1x64xf32, #tpu.memory_space<vmem>>, %arg7: memref<9x8x32xbf16, #tpu.memory_space<vmem>>, %arg8: memref<576x128xbf16, #tpu.memory_space<vmem>>, %arg9: memref<1x128xf32, #tpu.memory_space<vmem>>, %arg10: memref<512x256xbf16, #tpu.memory_space<vmem>>, %arg11: memref<1x256xf32, #tpu.memory_space<vmem>>, %arg12: memref<16x256xbf16, #tpu.memory_space<vmem>>, %arg13: memref<1x256xf32, #tpu.memory_space<vmem>>, %arg14: memref<256x128xbf16, #tpu.memory_space<vmem>>, %arg15: memref<1x128xf32, #tpu.memory_space<vmem>>, %arg16: memref<256x512xbf16, #tpu.memory_space<vmem>>, %arg17: memref<128x512xbf16, #tpu.memory_space<vmem>>, %arg18: memref<1x512xf32, #tpu.memory_space<vmem>>, %arg19: memref<512x128xbf16, #tpu.memory_space<vmem>>, %arg20: memref<1x128xf32, #tpu.memory_space<vmem>>, %arg21: memref<2x128xf32, #tpu.memory_space<vmem>>) attributes {dimension_semantics = [], scalar_prefetch = 0 : i64, scratch_operands = 0 : i64, tpu.core_type = #tpu.core_type<tc>} {
    %c0 = arith.constant 0 : index
    %c0_0 = arith.constant 0 : index
    %0 = vector.load %arg0[%c0, %c0_0] : memref<128x32xbf16, #tpu.memory_space<vmem>>, vector<128x32xbf16>
    %c0_1 = arith.constant 0 : index
    %c0_2 = arith.constant 0 : index
    %1 = vector.load %arg2[%c0_1, %c0_2] : memref<32x32xbf16, #tpu.memory_space<vmem>>, vector<32x32xbf16>
    %cst = arith.constant dense<0.000000e+00> : vector<128x32xf32>
    %2 = tpu.matmul %0, %1, %cst {dimension_numbers = #tpu.dot_dimension_numbers<[1], [0], [0], [1], [0, 0, 1, 1], [], []>} : vector<128x32xbf16>, vector<32x32xbf16>, vector<128x32xf32> -> vector<128x32xf32>
    %c0_3 = arith.constant 0 : index
    %c0_4 = arith.constant 0 : index
    %3 = vector.load %arg3[%c0_3, %c0_4] : memref<1x32xf32, #tpu.memory_space<vmem>>, vector<1x32xf32>
    %4 = vector.broadcast %3 : vector<1x32xf32> to vector<128x32xf32>
    %5 = arith.addf %2, %4 : vector<128x32xf32>
    %cst_5 = arith.constant 0.000000e+00 : f32
    %6 = vector.broadcast %cst_5 : f32 to vector<128x32xf32>
    %7 = arith.maximumf %5, %6 : vector<128x32xf32>
    %8 = arith.truncf %7 : vector<128x32xf32> to vector<128x32xbf16>
    %c0_6 = arith.constant 0 : index
    %c0_7 = arith.constant 0 : index
    %c0_8 = arith.constant 0 : index
    %9 = vector.load %arg4[%c0_6, %c0_7, %c0_8] : memref<9x32x128xbf16, #tpu.memory_space<vmem>>, vector<1x32x128xbf16>
    %10 = vector.shape_cast %9 : vector<1x32x128xbf16> to vector<32x128xbf16>
    %cst_9 = arith.constant dense<0.000000e+00> : vector<32x32xf32>
    %11 = tpu.matmul %10, %8, %cst_9 {dimension_numbers = #tpu.dot_dimension_numbers<[1], [0], [0], [1], [0, 0, 1, 1], [], []>} : vector<32x128xbf16>, vector<128x32xbf16>, vector<32x32xf32> -> vector<32x32xf32>
    %c1 = arith.constant 1 : index
    %c0_10 = arith.constant 0 : index
    %c0_11 = arith.constant 0 : index
    %12 = vector.load %arg4[%c1, %c0_10, %c0_11] : memref<9x32x128xbf16, #tpu.memory_space<vmem>>, vector<1x32x128xbf16>
    %13 = vector.shape_cast %12 : vector<1x32x128xbf16> to vector<32x128xbf16>
    %cst_12 = arith.constant dense<0.000000e+00> : vector<32x32xf32>
    %14 = tpu.matmul %13, %8, %cst_12 {dimension_numbers = #tpu.dot_dimension_numbers<[1], [0], [0], [1], [0, 0, 1, 1], [], []>} : vector<32x128xbf16>, vector<128x32xbf16>, vector<32x32xf32> -> vector<32x32xf32>
    %c2 = arith.constant 2 : index
    %c0_13 = arith.constant 0 : index
    %c0_14 = arith.constant 0 : index
    %15 = vector.load %arg4[%c2, %c0_13, %c0_14] : memref<9x32x128xbf16, #tpu.memory_space<vmem>>, vector<1x32x128xbf16>
    %16 = vector.shape_cast %15 : vector<1x32x128xbf16> to vector<32x128xbf16>
    %cst_15 = arith.constant dense<0.000000e+00> : vector<32x32xf32>
    %17 = tpu.matmul %16, %8, %cst_15 {dimension_numbers = #tpu.dot_dimension_numbers<[1], [0], [0], [1], [0, 0, 1, 1], [], []>} : vector<32x128xbf16>, vector<128x32xbf16>, vector<32x32xf32> -> vector<32x32xf32>
    %c3 = arith.constant 3 : index
    %c0_16 = arith.constant 0 : index
    %c0_17 = arith.constant 0 : index
    %18 = vector.load %arg4[%c3, %c0_16, %c0_17] : memref<9x32x128xbf16, #tpu.memory_space<vmem>>, vector<1x32x128xbf16>
    %19 = vector.shape_cast %18 : vector<1x32x128xbf16> to vector<32x128xbf16>
    %cst_18 = arith.constant dense<0.000000e+00> : vector<32x32xf32>
    %20 = tpu.matmul %19, %8, %cst_18 {dimension_numbers = #tpu.dot_dimension_numbers<[1], [0], [0], [1], [0, 0, 1, 1], [], []>} : vector<32x128xbf16>, vector<128x32xbf16>, vector<32x32xf32> -> vector<32x32xf32>
    %c4 = arith.constant 4 : index
    %c0_19 = arith.constant 0 : index
    %c0_20 = arith.constant 0 : index
    %21 = vector.load %arg4[%c4, %c0_19, %c0_20] : memref<9x32x128xbf16, #tpu.memory_space<vmem>>, vector<1x32x128xbf16>
    %22 = vector.shape_cast %21 : vector<1x32x128xbf16> to vector<32x128xbf16>
    %cst_21 = arith.constant dense<0.000000e+00> : vector<32x32xf32>
    %23 = tpu.matmul %22, %8, %cst_21 {dimension_numbers = #tpu.dot_dimension_numbers<[1], [0], [0], [1], [0, 0, 1, 1], [], []>} : vector<32x128xbf16>, vector<128x32xbf16>, vector<32x32xf32> -> vector<32x32xf32>
    %c5 = arith.constant 5 : index
    %c0_22 = arith.constant 0 : index
    %c0_23 = arith.constant 0 : index
    %24 = vector.load %arg4[%c5, %c0_22, %c0_23] : memref<9x32x128xbf16, #tpu.memory_space<vmem>>, vector<1x32x128xbf16>
    %25 = vector.shape_cast %24 : vector<1x32x128xbf16> to vector<32x128xbf16>
    %cst_24 = arith.constant dense<0.000000e+00> : vector<32x32xf32>
    %26 = tpu.matmul %25, %8, %cst_24 {dimension_numbers = #tpu.dot_dimension_numbers<[1], [0], [0], [1], [0, 0, 1, 1], [], []>} : vector<32x128xbf16>, vector<128x32xbf16>, vector<32x32xf32> -> vector<32x32xf32>
    %c6 = arith.constant 6 : index
    %c0_25 = arith.constant 0 : index
    %c0_26 = arith.constant 0 : index
    %27 = vector.load %arg4[%c6, %c0_25, %c0_26] : memref<9x32x128xbf16, #tpu.memory_space<vmem>>, vector<1x32x128xbf16>
    %28 = vector.shape_cast %27 : vector<1x32x128xbf16> to vector<32x128xbf16>
    %cst_27 = arith.constant dense<0.000000e+00> : vector<32x32xf32>
    %29 = tpu.matmul %28, %8, %cst_27 {dimension_numbers = #tpu.dot_dimension_numbers<[1], [0], [0], [1], [0, 0, 1, 1], [], []>} : vector<32x128xbf16>, vector<128x32xbf16>, vector<32x32xf32> -> vector<32x32xf32>
    %c7 = arith.constant 7 : index
    %c0_28 = arith.constant 0 : index
    %c0_29 = arith.constant 0 : index
    %30 = vector.load %arg4[%c7, %c0_28, %c0_29] : memref<9x32x128xbf16, #tpu.memory_space<vmem>>, vector<1x32x128xbf16>
    %31 = vector.shape_cast %30 : vector<1x32x128xbf16> to vector<32x128xbf16>
    %cst_30 = arith.constant dense<0.000000e+00> : vector<32x32xf32>
    %32 = tpu.matmul %31, %8, %cst_30 {dimension_numbers = #tpu.dot_dimension_numbers<[1], [0], [0], [1], [0, 0, 1, 1], [], []>} : vector<32x128xbf16>, vector<128x32xbf16>, vector<32x32xf32> -> vector<32x32xf32>
    %c8 = arith.constant 8 : index
    %c0_31 = arith.constant 0 : index
    %c0_32 = arith.constant 0 : index
    %33 = vector.load %arg4[%c8, %c0_31, %c0_32] : memref<9x32x128xbf16, #tpu.memory_space<vmem>>, vector<1x32x128xbf16>
    %34 = vector.shape_cast %33 : vector<1x32x128xbf16> to vector<32x128xbf16>
    %cst_33 = arith.constant dense<0.000000e+00> : vector<32x32xf32>
    %35 = tpu.matmul %34, %8, %cst_33 {dimension_numbers = #tpu.dot_dimension_numbers<[1], [0], [0], [1], [0, 0, 1, 1], [], []>} : vector<32x128xbf16>, vector<128x32xbf16>, vector<32x32xf32> -> vector<32x32xf32>
    %36 = tpu.concatenate %11, %14, %17, %20, %23, %26, %29, %32, %35 in 1 : vector<32x32xf32>, vector<32x32xf32>, vector<32x32xf32>, vector<32x32xf32>, vector<32x32xf32>, vector<32x32xf32>, vector<32x32xf32>, vector<32x32xf32>, vector<32x32xf32> -> vector<32x288xf32>
    %37 = arith.truncf %36 : vector<32x288xf32> to vector<32x288xbf16>
    %c0_34 = arith.constant 0 : index
    %c0_35 = arith.constant 0 : index
    %38 = vector.load %arg5[%c0_34, %c0_35] : memref<288x64xbf16, #tpu.memory_space<vmem>>, vector<288x64xbf16>
    %cst_36 = arith.constant dense<0.000000e+00> : vector<32x64xf32>
    %39 = tpu.matmul %37, %38, %cst_36 {dimension_numbers = #tpu.dot_dimension_numbers<[1], [0], [0], [1], [0, 0, 1, 1], [], []>} : vector<32x288xbf16>, vector<288x64xbf16>, vector<32x64xf32> -> vector<32x64xf32>
    %c0_37 = arith.constant 0 : index
    %c0_38 = arith.constant 0 : index
    %40 = vector.load %arg6[%c0_37, %c0_38] : memref<1x64xf32, #tpu.memory_space<vmem>>, vector<1x64xf32>
    %41 = vector.broadcast %40 : vector<1x64xf32> to vector<32x64xf32>
    %42 = arith.addf %39, %41 : vector<32x64xf32>
    %cst_39 = arith.constant 0.000000e+00 : f32
    %43 = vector.broadcast %cst_39 : f32 to vector<32x64xf32>
    %44 = arith.maximumf %42, %43 : vector<32x64xf32>
    %45 = arith.truncf %44 : vector<32x64xf32> to vector<32x64xbf16>
    %c0_40 = arith.constant 0 : index
    %c0_41 = arith.constant 0 : index
    %c0_42 = arith.constant 0 : index
    %46 = vector.load %arg7[%c0_40, %c0_41, %c0_42] : memref<9x8x32xbf16, #tpu.memory_space<vmem>>, vector<1x8x32xbf16>
    %47 = vector.shape_cast %46 : vector<1x8x32xbf16> to vector<8x32xbf16>
    %cst_43 = arith.constant dense<0.000000e+00> : vector<8x64xf32>
    %48 = tpu.matmul %47, %45, %cst_43 {dimension_numbers = #tpu.dot_dimension_numbers<[1], [0], [0], [1], [0, 0, 1, 1], [], []>} : vector<8x32xbf16>, vector<32x64xbf16>, vector<8x64xf32> -> vector<8x64xf32>
    %c1_44 = arith.constant 1 : index
    %c0_45 = arith.constant 0 : index
    %c0_46 = arith.constant 0 : index
    %49 = vector.load %arg7[%c1_44, %c0_45, %c0_46] : memref<9x8x32xbf16, #tpu.memory_space<vmem>>, vector<1x8x32xbf16>
    %50 = vector.shape_cast %49 : vector<1x8x32xbf16> to vector<8x32xbf16>
    %cst_47 = arith.constant dense<0.000000e+00> : vector<8x64xf32>
    %51 = tpu.matmul %50, %45, %cst_47 {dimension_numbers = #tpu.dot_dimension_numbers<[1], [0], [0], [1], [0, 0, 1, 1], [], []>} : vector<8x32xbf16>, vector<32x64xbf16>, vector<8x64xf32> -> vector<8x64xf32>
    %c2_48 = arith.constant 2 : index
    %c0_49 = arith.constant 0 : index
    %c0_50 = arith.constant 0 : index
    %52 = vector.load %arg7[%c2_48, %c0_49, %c0_50] : memref<9x8x32xbf16, #tpu.memory_space<vmem>>, vector<1x8x32xbf16>
    %53 = vector.shape_cast %52 : vector<1x8x32xbf16> to vector<8x32xbf16>
    %cst_51 = arith.constant dense<0.000000e+00> : vector<8x64xf32>
    %54 = tpu.matmul %53, %45, %cst_51 {dimension_numbers = #tpu.dot_dimension_numbers<[1], [0], [0], [1], [0, 0, 1, 1], [], []>} : vector<8x32xbf16>, vector<32x64xbf16>, vector<8x64xf32> -> vector<8x64xf32>
    %c3_52 = arith.constant 3 : index
    %c0_53 = arith.constant 0 : index
    %c0_54 = arith.constant 0 : index
    %55 = vector.load %arg7[%c3_52, %c0_53, %c0_54] : memref<9x8x32xbf16, #tpu.memory_space<vmem>>, vector<1x8x32xbf16>
    %56 = vector.shape_cast %55 : vector<1x8x32xbf16> to vector<8x32xbf16>
    %cst_55 = arith.constant dense<0.000000e+00> : vector<8x64xf32>
    %57 = tpu.matmul %56, %45, %cst_55 {dimension_numbers = #tpu.dot_dimension_numbers<[1], [0], [0], [1], [0, 0, 1, 1], [], []>} : vector<8x32xbf16>, vector<32x64xbf16>, vector<8x64xf32> -> vector<8x64xf32>
    %c4_56 = arith.constant 4 : index
    %c0_57 = arith.constant 0 : index
    %c0_58 = arith.constant 0 : index
    %58 = vector.load %arg7[%c4_56, %c0_57, %c0_58] : memref<9x8x32xbf16, #tpu.memory_space<vmem>>, vector<1x8x32xbf16>
    %59 = vector.shape_cast %58 : vector<1x8x32xbf16> to vector<8x32xbf16>
    %cst_59 = arith.constant dense<0.000000e+00> : vector<8x64xf32>
    %60 = tpu.matmul %59, %45, %cst_59 {dimension_numbers = #tpu.dot_dimension_numbers<[1], [0], [0], [1], [0, 0, 1, 1], [], []>} : vector<8x32xbf16>, vector<32x64xbf16>, vector<8x64xf32> -> vector<8x64xf32>
    %c5_60 = arith.constant 5 : index
    %c0_61 = arith.constant 0 : index
    %c0_62 = arith.constant 0 : index
    %61 = vector.load %arg7[%c5_60, %c0_61, %c0_62] : memref<9x8x32xbf16, #tpu.memory_space<vmem>>, vector<1x8x32xbf16>
    %62 = vector.shape_cast %61 : vector<1x8x32xbf16> to vector<8x32xbf16>
    %cst_63 = arith.constant dense<0.000000e+00> : vector<8x64xf32>
    %63 = tpu.matmul %62, %45, %cst_63 {dimension_numbers = #tpu.dot_dimension_numbers<[1], [0], [0], [1], [0, 0, 1, 1], [], []>} : vector<8x32xbf16>, vector<32x64xbf16>, vector<8x64xf32> -> vector<8x64xf32>
    %c6_64 = arith.constant 6 : index
    %c0_65 = arith.constant 0 : index
    %c0_66 = arith.constant 0 : index
    %64 = vector.load %arg7[%c6_64, %c0_65, %c0_66] : memref<9x8x32xbf16, #tpu.memory_space<vmem>>, vector<1x8x32xbf16>
    %65 = vector.shape_cast %64 : vector<1x8x32xbf16> to vector<8x32xbf16>
    %cst_67 = arith.constant dense<0.000000e+00> : vector<8x64xf32>
    %66 = tpu.matmul %65, %45, %cst_67 {dimension_numbers = #tpu.dot_dimension_numbers<[1], [0], [0], [1], [0, 0, 1, 1], [], []>} : vector<8x32xbf16>, vector<32x64xbf16>, vector<8x64xf32> -> vector<8x64xf32>
    %c7_68 = arith.constant 7 : index
    %c0_69 = arith.constant 0 : index
    %c0_70 = arith.constant 0 : index
    %67 = vector.load %arg7[%c7_68, %c0_69, %c0_70] : memref<9x8x32xbf16, #tpu.memory_space<vmem>>, vector<1x8x32xbf16>
    %68 = vector.shape_cast %67 : vector<1x8x32xbf16> to vector<8x32xbf16>
    %cst_71 = arith.constant dense<0.000000e+00> : vector<8x64xf32>
    %69 = tpu.matmul %68, %45, %cst_71 {dimension_numbers = #tpu.dot_dimension_numbers<[1], [0], [0], [1], [0, 0, 1, 1], [], []>} : vector<8x32xbf16>, vector<32x64xbf16>, vector<8x64xf32> -> vector<8x64xf32>
    %c8_72 = arith.constant 8 : index
    %c0_73 = arith.constant 0 : index
    %c0_74 = arith.constant 0 : index
    %70 = vector.load %arg7[%c8_72, %c0_73, %c0_74] : memref<9x8x32xbf16, #tpu.memory_space<vmem>>, vector<1x8x32xbf16>
    %71 = vector.shape_cast %70 : vector<1x8x32xbf16> to vector<8x32xbf16>
    %cst_75 = arith.constant dense<0.000000e+00> : vector<8x64xf32>
    %72 = tpu.matmul %71, %45, %cst_75 {dimension_numbers = #tpu.dot_dimension_numbers<[1], [0], [0], [1], [0, 0, 1, 1], [], []>} : vector<8x32xbf16>, vector<32x64xbf16>, vector<8x64xf32> -> vector<8x64xf32>
    %73 = tpu.concatenate %48, %51, %54, %57, %60, %63, %66, %69, %72 in 1 : vector<8x64xf32>, vector<8x64xf32>, vector<8x64xf32>, vector<8x64xf32>, vector<8x64xf32>, vector<8x64xf32>, vector<8x64xf32>, vector<8x64xf32>, vector<8x64xf32> -> vector<8x576xf32>
    %74 = arith.truncf %73 : vector<8x576xf32> to vector<8x576xbf16>
    %c0_76 = arith.constant 0 : index
    %c0_77 = arith.constant 0 : index
    %75 = vector.load %arg8[%c0_76, %c0_77] : memref<576x128xbf16, #tpu.memory_space<vmem>>, vector<576x128xbf16>
    %cst_78 = arith.constant dense<0.000000e+00> : vector<8x128xf32>
    %76 = tpu.matmul %74, %75, %cst_78 {dimension_numbers = #tpu.dot_dimension_numbers<[1], [0], [0], [1], [0, 0, 1, 1], [], []>} : vector<8x576xbf16>, vector<576x128xbf16>, vector<8x128xf32> -> vector<8x128xf32>
    %c0_79 = arith.constant 0 : index
    %c0_80 = arith.constant 0 : index
    %77 = vector.load %arg9[%c0_79, %c0_80] : memref<1x128xf32, #tpu.memory_space<vmem>>, vector<1x128xf32>
    %78 = vector.broadcast %77 : vector<1x128xf32> to vector<8x128xf32>
    %79 = arith.addf %76, %78 : vector<8x128xf32>
    %cst_81 = arith.constant 0.000000e+00 : f32
    %80 = vector.broadcast %cst_81 : f32 to vector<8x128xf32>
    %81 = arith.maximumf %79, %80 : vector<8x128xf32>
    %82 = vector.shape_cast %81 : vector<8x128xf32> to vector<2x512xf32>
    %83 = arith.truncf %82 : vector<2x512xf32> to vector<2x512xbf16>
    %c0_82 = arith.constant 0 : index
    %c0_83 = arith.constant 0 : index
    %84 = vector.load %arg10[%c0_82, %c0_83] : memref<512x256xbf16, #tpu.memory_space<vmem>>, vector<512x256xbf16>
    %cst_84 = arith.constant dense<0.000000e+00> : vector<2x256xf32>
    %85 = tpu.matmul %83, %84, %cst_84 {dimension_numbers = #tpu.dot_dimension_numbers<[1], [0], [0], [1], [0, 0, 1, 1], [], []>} : vector<2x512xbf16>, vector<512x256xbf16>, vector<2x256xf32> -> vector<2x256xf32>
    %c0_85 = arith.constant 0 : index
    %c0_86 = arith.constant 0 : index
    %86 = vector.load %arg11[%c0_85, %c0_86] : memref<1x256xf32, #tpu.memory_space<vmem>>, vector<1x256xf32>
    %87 = vector.broadcast %86 : vector<1x256xf32> to vector<2x256xf32>
    %88 = arith.addf %85, %87 : vector<2x256xf32>
    %cst_87 = arith.constant 0.000000e+00 : f32
    %89 = vector.broadcast %cst_87 : f32 to vector<2x256xf32>
    %90 = arith.maximumf %88, %89 : vector<2x256xf32>
    %c0_88 = arith.constant 0 : index
    %c0_89 = arith.constant 0 : index
    %91 = vector.load %arg1[%c0_88, %c0_89] : memref<2x16xbf16, #tpu.memory_space<vmem>>, vector<2x16xbf16>
    %c0_90 = arith.constant 0 : index
    %c0_91 = arith.constant 0 : index
    %92 = vector.load %arg12[%c0_90, %c0_91] : memref<16x256xbf16, #tpu.memory_space<vmem>>, vector<16x256xbf16>
    %cst_92 = arith.constant dense<0.000000e+00> : vector<2x256xf32>
    %93 = tpu.matmul %91, %92, %cst_92 {dimension_numbers = #tpu.dot_dimension_numbers<[1], [0], [0], [1], [0, 0, 1, 1], [], []>} : vector<2x16xbf16>, vector<16x256xbf16>, vector<2x256xf32> -> vector<2x256xf32>
    %c0_93 = arith.constant 0 : index
    %c0_94 = arith.constant 0 : index
    %94 = vector.load %arg13[%c0_93, %c0_94] : memref<1x256xf32, #tpu.memory_space<vmem>>, vector<1x256xf32>
    %95 = vector.broadcast %94 : vector<1x256xf32> to vector<2x256xf32>
    %96 = arith.addf %93, %95 : vector<2x256xf32>
    %cst_95 = arith.constant 0.000000e+00 : f32
    %97 = vector.broadcast %cst_95 : f32 to vector<2x256xf32>
    %98 = arith.maximumf %96, %97 : vector<2x256xf32>
    %99 = arith.truncf %98 : vector<2x256xf32> to vector<2x256xbf16>
    %c0_96 = arith.constant 0 : index
    %c0_97 = arith.constant 0 : index
    %100 = vector.load %arg14[%c0_96, %c0_97] : memref<256x128xbf16, #tpu.memory_space<vmem>>, vector<256x128xbf16>
    %cst_98 = arith.constant dense<0.000000e+00> : vector<2x128xf32>
    %101 = tpu.matmul %99, %100, %cst_98 {dimension_numbers = #tpu.dot_dimension_numbers<[1], [0], [0], [1], [0, 0, 1, 1], [], []>} : vector<2x256xbf16>, vector<256x128xbf16>, vector<2x128xf32> -> vector<2x128xf32>
    %c0_99 = arith.constant 0 : index
    %c0_100 = arith.constant 0 : index
    %102 = vector.load %arg15[%c0_99, %c0_100] : memref<1x128xf32, #tpu.memory_space<vmem>>, vector<1x128xf32>
    %103 = vector.broadcast %102 : vector<1x128xf32> to vector<2x128xf32>
    %104 = arith.addf %101, %103 : vector<2x128xf32>
    %cst_101 = arith.constant 0.000000e+00 : f32
    %105 = vector.broadcast %cst_101 : f32 to vector<2x128xf32>
    %106 = arith.maximumf %104, %105 : vector<2x128xf32>
    %107 = arith.truncf %90 : vector<2x256xf32> to vector<2x256xbf16>
    %c0_102 = arith.constant 0 : index
    %c0_103 = arith.constant 0 : index
    %108 = vector.load %arg16[%c0_102, %c0_103] : memref<256x512xbf16, #tpu.memory_space<vmem>>, vector<256x512xbf16>
    %cst_104 = arith.constant dense<0.000000e+00> : vector<2x512xf32>
    %109 = tpu.matmul %107, %108, %cst_104 {dimension_numbers = #tpu.dot_dimension_numbers<[1], [0], [0], [1], [0, 0, 1, 1], [], []>} : vector<2x256xbf16>, vector<256x512xbf16>, vector<2x512xf32> -> vector<2x512xf32>
    %110 = arith.truncf %106 : vector<2x128xf32> to vector<2x128xbf16>
    %c0_105 = arith.constant 0 : index
    %c0_106 = arith.constant 0 : index
    %111 = vector.load %arg17[%c0_105, %c0_106] : memref<128x512xbf16, #tpu.memory_space<vmem>>, vector<128x512xbf16>
    %cst_107 = arith.constant dense<0.000000e+00> : vector<2x512xf32>
    %112 = tpu.matmul %110, %111, %cst_107 {dimension_numbers = #tpu.dot_dimension_numbers<[1], [0], [0], [1], [0, 0, 1, 1], [], []>} : vector<2x128xbf16>, vector<128x512xbf16>, vector<2x512xf32> -> vector<2x512xf32>
    %113 = arith.addf %109, %112 : vector<2x512xf32>
    %c0_108 = arith.constant 0 : index
    %c0_109 = arith.constant 0 : index
    %114 = vector.load %arg18[%c0_108, %c0_109] : memref<1x512xf32, #tpu.memory_space<vmem>>, vector<1x512xf32>
    %115 = vector.broadcast %114 : vector<1x512xf32> to vector<2x512xf32>
    %116 = arith.addf %113, %115 : vector<2x512xf32>
    %cst_110 = arith.constant 0.000000e+00 : f32
    %117 = vector.broadcast %cst_110 : f32 to vector<2x512xf32>
    %118 = arith.maximumf %116, %117 : vector<2x512xf32>
    %119 = arith.truncf %118 : vector<2x512xf32> to vector<2x512xbf16>
    %c0_111 = arith.constant 0 : index
    %c0_112 = arith.constant 0 : index
    %120 = vector.load %arg19[%c0_111, %c0_112] : memref<512x128xbf16, #tpu.memory_space<vmem>>, vector<512x128xbf16>
    %cst_113 = arith.constant dense<0.000000e+00> : vector<2x128xf32>
    %121 = tpu.matmul %119, %120, %cst_113 {dimension_numbers = #tpu.dot_dimension_numbers<[1], [0], [0], [1], [0, 0, 1, 1], [], []>} : vector<2x512xbf16>, vector<512x128xbf16>, vector<2x128xf32> -> vector<2x128xf32>
    %c0_114 = arith.constant 0 : index
    %c0_115 = arith.constant 0 : index
    %122 = vector.load %arg20[%c0_114, %c0_115] : memref<1x128xf32, #tpu.memory_space<vmem>>, vector<1x128xf32>
    %123 = vector.broadcast %122 : vector<1x128xf32> to vector<2x128xf32>
    %124 = arith.addf %121, %123 : vector<2x128xf32>
    %125 = math.tanh %124 : vector<2x128xf32>
    %c0_116 = arith.constant 0 : index
    %c0_117 = arith.constant 0 : index
    %126 = vector.load %arg21[%c0_116, %c0_117] : memref<2x128xf32, #tpu.memory_space<vmem>>, vector<2x128xf32>
    tpu.vector_store %arg21[%c0_116, %c0_117], %125 {strides = array<i32>} : memref<2x128xf32, #tpu.memory_space<vmem>>, vector<2x128xf32>,
    return
  }
}

</mosaic_0001>

<bundles_post_ra>
// kernel: tpu_custom_call.1
= control target key start
LH: loop header
LB: loop body
LE: loop exit
PB: predicated region body
PF: predicated region fallthrough
CT: control target
= control target key end

     0   :  { %s6632_s0 = inlined_call_operand.vmem [shape: bf16[128,32], index: 0, kind: input, shape index: {}]   ;;  %s6633_s1 = inlined_call_operand.vmem [shape: bf16[2,16], index: 1, kind: input, shape index: {}]   ;;  %s6634_s2 = inlined_call_operand.hbm [shape: bf16[32,32], index: 2, kind: input, shape index: {}]   ;;  %s6635_s3 = inlined_call_operand.hbm [shape: f32[1,32], index: 3, kind: input, shape index: {}]   ;;  %s6636_s4 = inlined_call_operand.hbm [shape: bf16[9,32,128], index: 4, kind: input, shape index: {}]   ;;  %s6637_s5 = inlined_call_operand.vmem [shape: bf16[288,64], index: 5, kind: input, shape index: {}]   ;;  %s6638_s6 = inlined_call_operand.hbm [shape: f32[1,64], index: 6, kind: input, shape index: {}]   ;;  %s6639_s7 = inlined_call_operand.vmem [shape: bf16[9,8,32], index: 7, kind: input, shape index: {}]   ;;  %s6640_s8 = inlined_call_operand.vmem [shape: bf16[576,128], index: 8, kind: input, shape index: {}]   ;;  %s6641_s9 = inlined_call_operand.hbm [shape: f32[1,128], index: 9, kind: input, shape index: {}]   ;;  %s6642_s10 = inlined_call_operand.hbm [shape: bf16[512,256], index: 10, kind: input, shape index: {}]   ;;  %s6643_s11 = inlined_call_operand.hbm [shape: f32[1,256], index: 11, kind: input, shape index: {}]   ;;  %s6644_s12 = inlined_call_operand.vmem [shape: bf16[16,256], index: 12, kind: input, shape index: {}]   ;;  %s6645_s13 = inlined_call_operand.hbm [shape: f32[1,256], index: 13, kind: input, shape index: {}]   ;;  %s6646_s14 = inlined_call_operand.hbm [shape: bf16[256,128], index: 14, kind: input, shape index: {}]   ;;  %s6647_s15 = inlined_call_operand.hbm [shape: f32[1,128], index: 15, kind: input, shape index: {}]   ;;  %s6648_s16 = inlined_call_operand.hbm [shape: bf16[256,512], index: 16, kind: input, shape index: {}]   ;;  %s6649_s17 = inlined_call_operand.hbm [shape: bf16[128,512], index: 17, kind: input, shape index: {}]   ;;  %s6650_s18 = inlined_call_operand.vmem [shape: f32[1,512], index: 18, kind: input, shape index: {}]   ;;  %s6651_s19 = inlined_call_operand.hbm [shape: bf16[512,128], index: 19, kind: input, shape index: {}]   ;;  %s6652_s20 = inlined_call_operand.vmem [shape: f32[1,128], index: 20, kind: input, shape index: {}]   ;;  %s6653_s21 = inlined_call_operand.hbm [shape: f32[2,128], index: 21, kind: output, shape index: {}]  }
   0x1   :  { %6656 = sst [smem:[#allocation32_spill]] %s6632_s0 }
   0x2   :  { %6657 = sst [smem:[#allocation33_spill]] %s6633_s1 }
   0x3   :  { %6658 = sst [smem:[#allocation34_spill]] %s6634_s2 }
   0x4   :  { %6659 = sst [smem:[#allocation35_spill]] %s6635_s3 }
   0x5   :  { %6660 = sst [smem:[#allocation36_spill]] %s6636_s4 }
   0x6   :  { %6661 = sst [smem:[#allocation37_spill]] %s6637_s5 }
   0x7   :  { %26 = vsyncpa [#allocation3], 0 }
   0x8   :  { %27 = vsyncpa [#allocation6], 0 }
   0x9   :  { %28 = vsyncpa [#allocation9], 0 }
   0xa   :  { %29 = vsyncpa [#allocation12], 0 }
   0xb   :  { %30 = vsyncpa [#allocation15], 0 }
   0xc   :  { %31 = vsyncpa [#allocation18], 0 }
   0xd   :  { %32 = vsyncpa [#allocation21], 0 }
   0xe   :  { %33 = vsyncpa [#allocation4], 0  ;;  %s5855_s2 = smov [#allocation5]   ;;  %s5856_s26 = smov [#allocation8]  }
   0xf   :  { %s56_s25 = sshll.u32 %s5855_s2, 4  ;;  %s80_s27 = sshll.u32 %s5856_s26, 4  ;;  %s57_s25 = int_to_ptr.vmem [resolvable:$true] %s56_s25  ;;  %s81_s27 = int_to_ptr.vmem [resolvable:$true] %s80_s27 }
  0x10   :  { %s5567_s3 = scalar_lea.vmem %s57_s25, 16  ;;  %s5571_s28 = scalar_lea.vmem %s57_s25, 32 }
  0x11   :  { %p5568_p0 = scmp.ne.s32.totalorder %s57_s25, %s5567_s3  ;;  %p5572_p1 = scmp.lt.s32.totalorder %s57_s25, %s57_s25 }
  0x12   :  { %p5573_p2 = scmp.lt.s32.totalorder %s5571_s28, %s5567_s3 }
  0x14   :  { %p5574_p3 = por %p5573_p2, %p5572_p1 }
  0x16   :  { %p5575_p4 = pnand %p5574_p3, %p5568_p0 }
  0x18   :  { %5578 = shalt.err (!%p5575_p4)
}
  0x19   :  { %s6662_s4 = sld [smem:[#allocation35_spill]]  ;;  %s5587_s30 = scalar_lea.vmem %s81_s27, 16 }
  0x1a   :  { %p5588_p5 = scmp.ne.s32.totalorder %s81_s27, %s5587_s30  ;;  %s5591_s5 = scalar_lea.vmem %s81_s27, 32 }
  0x1b   :  { %p5592_p6 = scmp.lt.s32.totalorder %s81_s27, %s81_s27  ;;  %p5593_p7 = scmp.lt.s32.totalorder %s5591_s5, %s5587_s30 }
  0x1d   :  { %p5594_p8 = por %p5593_p7, %p5592_p6 }
  0x1f   :  { %59 = dma.hbm_to_vmem [thread:$0]  %s6662_s4, 16, %s57_s25, [#allocation6]  }
  0x20   :  { %p5595_p9 = pnand %p5594_p8, %p5588_p5 }
  0x22   :  { %5598 = shalt.err (!%p5595_p9)
}
  0x23   :  { %83 = dma.hbm_to_vmem [thread:$0]  %s6638_s6, 16, %s81_s27, [#allocation9]  }
  0x24   :  { %s5857_s1 = smov [#allocation11]  }
  0x25   :  { %s103_s24 = sshll.u32 %s5857_s1, 4  ;;  %s104_s24 = int_to_ptr.vmem [resolvable:$true] %s103_s24 }
  0x26   :  { %s5607_s2 = scalar_lea.vmem %s104_s24, 8192  ;;  %p5612_p11 = scmp.lt.s32.totalorder %s104_s24, %s104_s24 }
  0x27   :  { %p5608_p10 = scmp.ne.s32.totalorder %s104_s24, %s5607_s2  ;;  %p5613_p12 = scmp.lt.s32.totalorder %s5607_s2, %s5607_s2 }
  0x29   :  { %p5614_p13 = por %p5613_p12, %p5612_p11 }
  0x2b   :  { %p5615_p0 = pnand %p5614_p13, %p5608_p10 }
  0x2d   :  { %5618 = shalt.err (!%p5615_p0)
}
  0x2e   :  { %s5858_s25 = smov 128   ;;  %s5859_s26 = smov 8  }
  0x2f   :  { %109 = dma.hbm_to_vmem [thread:$0]  %s6642_s10, 8192, %s104_s24, [#allocation12], %s5858_s25, %s5858_s25, %s5859_s26  }
  0x30   :  { %s5860_s29 = smov [#allocation14]   ;;  %s5861_s6 = smov [#allocation17]  }
  0x31   :  { %s128_s0 = sshll.u32 %s5860_s29, 4  ;;  %s150_s27 = sshll.u32 %s5861_s6, 4  ;;  %s129_s0 = int_to_ptr.vmem [resolvable:$true] %s128_s0  ;;  %s151_s27 = int_to_ptr.vmem [resolvable:$true] %s150_s27 }
  0x32   :  { %s5627_s4 = scalar_lea.vmem %s129_s0, 32  ;;  %p5632_p2 = scmp.lt.s32.totalorder %s129_s0, %s129_s0 }
  0x33   :  { %p5628_p1 = scmp.ne.s32.totalorder %s129_s0, %s5627_s4  ;;  %p5633_p3 = scmp.lt.s32.totalorder %s5627_s4, %s5627_s4 }
  0x35   :  { %p5634_p4 = por %p5633_p3, %p5632_p2 }
  0x37   :  { %p5635_p5 = pnand %p5634_p4, %p5628_p1 }
  0x39   :  { %5638 = shalt.err (!%p5635_p5)
}
  0x3a   :  { %131 = dma.hbm_to_vmem [thread:$0]  %s6645_s13, 32, %s129_s0, [#allocation15]  }
  0x3b   :  { %s5647_s22 = scalar_lea.vmem %s151_s27, 16  ;;  %s5651_s10 = scalar_lea.vmem %s151_s27, 32 }
  0x3c   :  { %p5648_p6 = scmp.ne.s32.totalorder %s151_s27, %s5647_s22  ;;  %p5652_p7 = scmp.lt.s32.totalorder %s151_s27, %s151_s27 }
  0x3d   :  { %p5653_p8 = scmp.lt.s32.totalorder %s5651_s10, %s5647_s22 }
  0x3f   :  { %p5654_p9 = por %p5653_p8, %p5652_p7 }
  0x41   :  { %p5655_p10 = pnand %p5654_p9, %p5648_p6 }
  0x43   :  { %5658 = shalt.err (!%p5655_p10)
}
  0x44   :  { %153 = dma.hbm_to_vmem [thread:$0]  %s6647_s15, 16, %s151_s27, [#allocation18]  }
  0x45   :  { %s5862_s24 = smov [#allocation20]   ;;  %s5863_s25 = smov [#allocation2]  }
  0x46   :  { %s171_s2 = sshll.u32 %s5862_s24, 4  ;;  %s43_s26 = sshll.u32 %s5863_s25, 4  ;;  %s172_s2 = int_to_ptr.vmem [resolvable:$true] %s171_s2  ;;  %s44_s26 = int_to_ptr.vmem [resolvable:$true] %s43_s26 }
  0x47   :  { %s5667_s3 = scalar_lea.vmem %s172_s2, 4096  ;;  %p5672_p12 = scmp.lt.s32.totalorder %s172_s2, %s172_s2 }
  0x48   :  { %p5668_p11 = scmp.ne.s32.totalorder %s172_s2, %s5667_s3  ;;  %p5673_p13 = scmp.lt.s32.totalorder %s5667_s3, %s5667_s3 }
  0x4a   :  { %p5674_p0 = por %p5673_p13, %p5672_p12 }
  0x4c   :  { %p5675_p1 = pnand %p5674_p0, %p5668_p11 }
  0x4e   :  { %5678 = shalt.err (!%p5675_p1)
}
  0x4f   :  { %s5864_s13 = smov 256   ;;  %s5865_s28 = smov 16  }
  0x50   :  { %177 = dma.hbm_to_vmem [thread:$0]  %s6649_s17, 4096, %s172_s2, [#allocation21], %s5864_s13, %s5864_s13, %s5865_s28  }
  0x51   :  { %s5687_s15 = scalar_lea.vmem %s44_s26, 256  ;;  %p5692_p3 = scmp.lt.s32.totalorder %s44_s26, %s44_s26 }
  0x52   :  { %p5688_p2 = scmp.ne.s32.totalorder %s44_s26, %s5687_s15  ;;  %p5693_p4 = scmp.lt.s32.totalorder %s5687_s15, %s5687_s15 }
  0x54   :  { %p5694_p5 = por %p5693_p4, %p5692_p3 }
  0x56   :  { %p5695_p6 = pnand %p5694_p5, %p5688_p2 }
  0x58   :  { %5698 = shalt.err (!%p5695_p6)
}
  0x59   :  { %s5866_s6 = smov 64   ;;  %s5867_s27 = smov 4  }
  0x5a   :  { %s6663_s5 = sld [smem:[#allocation34_spill]]  ;;  %s5868_s22 = smov [#allocation7]  }
  0x5b   :  { %s65_s10 = sshll.u32 %s5868_s22, 4  ;;  %s5869_s17 = smov [#allocation10]   ;;  %s66_s10 = int_to_ptr.vmem [resolvable:$true] %s65_s10 }
  0x5c   :  { %s94_s23 = sshll.u32 %s5869_s17, 4  ;;  %s5707_s1 = scalar_lea.vmem %s66_s10, 2304  ;;  %s95_s23 = int_to_ptr.vmem [resolvable:$true] %s94_s23 }
  0x5d   :  { %p5708_p7 = scmp.ne.s32.totalorder %s66_s10, %s5707_s1  ;;  %p5712_p8 = scmp.lt.s32.totalorder %s66_s10, %s66_s10 }
  0x5e   :  { %p5713_p9 = scmp.lt.s32.totalorder %s5707_s1, %s5707_s1 }
  0x60   :  { %49 = dma.hbm_to_vmem [thread:$0]  %s6663_s5, 256, %s44_s26, [#allocation3], %s5866_s6, %s5866_s6, %s5867_s27  }
  0x61   :  { %p5714_p10 = por %p5713_p9, %p5712_p8 }
  0x63   :  { %p5715_p11 = pnand %p5714_p10, %p5708_p7 }
  0x65   :  { %5718 = shalt.err (!%p5715_p11)
}
  0x66   :  { %s6664_s25 = sld [smem:[#allocation36_spill]]  ;;  %s5727_s26 = scalar_lea.vmem %s95_s23, 16 }
  0x67   :  { %p5728_p12 = scmp.ne.s32.totalorder %s95_s23, %s5727_s26  ;;  %s5731_s3 = scalar_lea.vmem %s95_s23, 32 }
  0x68   :  { %p5732_p13 = scmp.lt.s32.totalorder %s95_s23, %s95_s23  ;;  %p5733_p0 = scmp.lt.s32.totalorder %s5731_s3, %s5727_s26 }
  0x6a   :  { %p5734_p1 = por %p5733_p0, %p5732_p13 }
  0x6c   :  { %71 = dma.hbm_to_vmem [thread:$0]  %s6664_s25, 2304, %s66_s10, [#allocation6], %s5866_s6, %s5866_s6, %s5867_s27  }
  0x6d   :  { %p5735_p2 = pnand %p5734_p1, %p5728_p12 }
  0x6f   :  { %5738 = shalt.err (!%p5735_p2)
}
  0x70   :  { %97 = dma.hbm_to_vmem [thread:$0]  %s6641_s9, 16, %s95_s23, [#allocation9]  }
  0x71   :  { %s5870_s15 = smov [#allocation13]   ;;  %s5871_s30 = smov [#allocation16]  }
  0x72   :  { %s116_s4 = sshll.u32 %s5870_s15, 4  ;;  %s137_s5 = sshll.u32 %s5871_s30, 4  ;;  %s117_s4 = int_to_ptr.vmem [resolvable:$true] %s116_s4  ;;  %s138_s5 = int_to_ptr.vmem [resolvable:$true] %s137_s5 }
  0x73   :  { %s5747_s22 = scalar_lea.vmem %s117_s4, 32  ;;  %p5752_p4 = scmp.lt.s32.totalorder %s117_s4, %s117_s4 }
  0x74   :  { %p5748_p3 = scmp.ne.s32.totalorder %s117_s4, %s5747_s22  ;;  %p5753_p5 = scmp.lt.s32.totalorder %s5747_s22, %s5747_s22 }
  0x76   :  { %p5754_p6 = por %p5753_p5, %p5752_p4 }
  0x78   :  { %p5755_p7 = pnand %p5754_p6, %p5748_p3 }
  0x7a   :  { %5758 = shalt.err (!%p5755_p7)
}
  0x7b   :  { %119 = dma.hbm_to_vmem [thread:$0]  %s6643_s11, 32, %s117_s4, [#allocation12]  }
  0x7c   :  { %s5767_s1 = scalar_lea.vmem %s138_s5, 2048  ;;  %p5772_p9 = scmp.lt.s32.totalorder %s138_s5, %s138_s5 }
  0x7d   :  { %p5768_p8 = scmp.ne.s32.totalorder %s138_s5, %s5767_s1  ;;  %p5773_p10 = scmp.lt.s32.totalorder %s5767_s1, %s5767_s1 }
  0x7f   :  { %p5774_p11 = por %p5773_p10, %p5772_p9 }
  0x81   :  { %p5775_p12 = pnand %p5774_p11, %p5768_p8 }
  0x83   :  { %5778 = shalt.err (!%p5775_p12)
}
  0x84   :  { %143 = dma.hbm_to_vmem [thread:$0]  %s6646_s14, 2048, %s138_s5, [#allocation15], %s5866_s6, %s5866_s6, %s5867_s27  }
  0x85   :  { %s5872_s24 = smov [#allocation19]   ;;  %s5873_s25 = smov [#allocation22]  }
  0x86   :  { %s159_s2 = sshll.u32 %s5872_s24, 4  ;;  %s185_s11 = sshll.u32 %s5873_s25, 4  ;;  %s160_s2 = int_to_ptr.vmem [resolvable:$true] %s159_s2  ;;  %s186_s11 = int_to_ptr.vmem [resolvable:$true] %s185_s11 }
  0x87   :  { %s5787_s26 = scalar_lea.vmem %s160_s2, 8192  ;;  %p5792_p0 = scmp.lt.s32.totalorder %s160_s2, %s160_s2 }
  0x88   :  { %p5788_p13 = scmp.ne.s32.totalorder %s160_s2, %s5787_s26  ;;  %p5793_p1 = scmp.lt.s32.totalorder %s5787_s26, %s5787_s26 }
  0x8a   :  { %p5794_p2 = por %p5793_p1, %p5792_p0 }
  0x8c   :  { %p5795_p3 = pnand %p5794_p2, %p5788_p13 }
  0x8e   :  { %5798 = shalt.err (!%p5795_p3)
}
  0x8f   :  { %165 = dma.hbm_to_vmem [thread:$0]  %s6648_s16, 8192, %s160_s2, [#allocation18], %s5864_s13, %s5864_s13, %s5865_s28  }
  0x90   :  { %s5807_s14 = scalar_lea.vmem %s186_s11, 4096  ;;  %p5812_p5 = scmp.lt.s32.totalorder %s186_s11, %s186_s11 }
  0x91   :  { %p5808_p4 = scmp.ne.s32.totalorder %s186_s11, %s5807_s14  ;;  %p5813_p6 = scmp.lt.s32.totalorder %s5807_s14, %s5807_s14 }
  0x93   :  { %p5814_p7 = por %p5813_p6, %p5812_p5 }
  0x95   :  { %p5815_p8 = pnand %p5814_p7, %p5808_p4 }
  0x97   :  { %5818 = shalt.err (!%p5815_p8)
}
  0x98   :  { %191 = dma.hbm_to_vmem [thread:$0]  %s6651_s19, 4096, %s186_s11, [#allocation21], %s5866_s6, %s5866_s6, %s5867_s27  }
  0x99   :  { %5839 = dma.done.wait [#allocation3], 256  }
  0x9a   :  { %5840 = vsyncadd [#allocation3], 4294967040 }
  0x9b   :  { %5841 = dma.done.wait [#allocation6], 2320  }
  0x9c   :  { %5842 = vsyncadd [#allocation6], 4294964976 }
  0x9d   :  { %5843 = dma.done.wait [#allocation9], 32  }
  0x9e   :  { %5844 = vsyncadd [#allocation9], 4294967264 }
  0x9f   :  { %5845 = dma.done.wait [#allocation12], 8224  }
  0xa0   :  { %5846 = vsyncadd [#allocation12], 4294959072 }
  0xa1   :  { %5847 = dma.done.wait [#allocation15], 2080  }
  0xa2   :  { %5848 = vsyncadd [#allocation15], 4294965216 }
  0xa3   :  { %5849 = dma.done.wait [#allocation18], 8208  }
  0xa4   :  { %5850 = vsyncadd [#allocation18], 4294959088 }
  0xa5   :  { %5851 = dma.done.wait [#allocation21], 8192  }
  0xa6   :  { %5852 = vsyncadd [#allocation21], 4294959104  ;;  %v5184_v0 = vld [vmem:[#allocation2 + $0x8] sm:$0xff]   ;;  %v5185_v1 = vld [vmem:[#allocation2] sm:$0xff]   ;;  %vm313_vm0 = vcmask 261120   ;;  %s6665_s13 = sld [smem:[#allocation32_spill]] }
  0xa7   :  { %4795 = vmatprep.subr.bf16.mxu0 %v5184_v0  ;;  %v5194_v10 = vld [vmem:[#allocation7] sm:$0xff]   ;;  %v5195_v11 = vld [vmem:[#allocation7 + $0x10] sm:$0xff]   ;;  %v4195_v25 = vld [vmem:[#allocation5] ss:$0 sm:$0xff]  ;;  %s5874_s11 = smov 32   ;;  %s5875_s26 = smov 96  }
  0xa8   :  { %4796 = vmatpush3.bf16.msra.mxu0 %v5184_v0  ;;  %4831 = vmatprep.mubr.bf16.mxu1 %v5194_v10  ;;  %v5201_v10 = vld [vmem:[#allocation7 + $0x38] sm:$0xff]   ;;  %s6666_s14 = sld [smem:[#allocation37_spill]]  ;;  %vm1152_vm1 = vcmask 523264   ;;  %vm1157_vm2 = vcmask 785408   ;;  %vm5877_vm3 = vmmov 0   ;;  %vm2827_vm4 = vcmask 130048  }
  0xa9   :  { %4797 = vmatprep.subr.bf16.mxu0 %v5185_v1  ;;  %s6667_s30 = sld [smem:[#allocation33_spill]] }
  0xac   :  { %v5186_v2 = vld [vmem:[%s6665_s13] sm:$0xff]   ;;  %v5187_v3 = vld [vmem:[%s6665_s13 + $0x8] sm:$0xff]   ;;  %4798 = vmatpush3.bf16.msra.mxu0 %v5185_v1  ;;  %v5188_v4 = vld [vmem:[%s6665_s13 + $0x10] sm:$0xff]  }
  0xad   :  { %4799 = vmatprep.mubr.msk.bf16.mxu0 %vm313_vm0, %v5186_v2  ;;  %v5189_v5 = vld [vmem:[%s6665_s13 + $0x18] sm:$0xff]   ;;  %v5190_v6 = vld [vmem:[%s6665_s13 + $0x20] sm:$0xff]   ;;  %v5191_v7 = vld [vmem:[%s6665_s13 + $0x28] sm:$0xff]  }
  0xae   :  { %v5192_v8 = vld [vmem:[%s6665_s13 + $0x30] sm:$0xff]   ;;  %v5193_v9 = vld [vmem:[%s6665_s13 + $0x38] sm:$0xff]  }
  0xaf   :  { %4800 = vmatmul.mubr.msk.bf16.vlgmr.msra.gmra.mxu0 %vm313_vm0, %v5187_v3 }
  0xb0   :  { %4803 = vmatprep.mubr.msk.bf16.mxu0 %vm313_vm0, %v5188_v4 }
  0xb7   :  { %4804 = vmatmul.mubr.msk.bf16.gmra.mxu0 %vm313_vm0, %v5189_v5  ;;  %v5196_v5 = vld [vmem:[#allocation7 + $0x8] sm:$0xff]  }
  0xb8   :  { %4807 = vmatprep.mubr.msk.bf16.mxu0 %vm313_vm0, %v5190_v6  ;;  %v5197_v6 = vld [vmem:[#allocation7 + $0x18] sm:$0xff]  }
  0xbf   :  { %4808 = vmatmul.mubr.msk.bf16.gmra.mxu0 %vm313_vm0, %v5191_v7  ;;  %v5198_v7 = vld [vmem:[#allocation7 + $0x20] sm:$0xff]  }
  0xc0   :  { %4811 = vmatprep.mubr.msk.bf16.mxu0 %vm313_vm0, %v5192_v8  ;;  %v5199_v8 = vld [vmem:[#allocation7 + $0x30] sm:$0xff]  }
  0xc7   :  { %4812 = vmatmul.mubr.msk.bf16.gmra.mxu0 %vm313_vm0, %v5193_v9  ;;  %v5200_v9 = vld [vmem:[#allocation7 + $0x28] sm:$0xff]  }
  0xc8   :  { %4851 = vmatprep.mubr.bf16.mxu0 %v5195_v11  ;;  %v5202_v11 = vld [vmem:[#allocation7 + $0x40] sm:$0xff]  }
 0x16f   :  { %v4801_v12 = vpop.f32.mrf.mxu0 }
 0x170   :  { %v381_v58 = vadd.f32 %v4801_v12, %v4195_v25  ;;  %v5203_v12 = vld [vmem:[#allocation7 + $0x50] sm:$0xff]  }
 0x171   :  { %v6081_v13 = vpop.f32.mrf.mxu0 }
 0x172   :  { %v437_v63 = vmax.f32 %v381_v58, 0.0  ;;  %v373_v0 = vadd.f32 %v4195_v25, %v6081_v13  ;;  %v5204_v13 = vld [vmem:[#allocation7 + $0x48] sm:$0xff]  }
 0x173   :  { %v4802_v14 = vpop.f32.mrf.mxu0  ;;  %v5221_v58 = vld [vmem:[%s6666_s14 + $0x18] sm:$0xff]  }
 0x174   :  { %v384_v55 = vadd.f32 %v4802_v14, %v4195_v25  ;;  %v435_v3 = vmax.f32 %v373_v0, 0.0  ;;  %v5205_v14 = vld [vmem:[#allocation7 + $0x58] sm:$0xff]  }
 0x175   :  { %v6083_v15 = vpop.f32.mrf.mxu0 }
 0x176   :  { %v438_v60 = vmax.f32 %v384_v55, 0.0  ;;  %v376_v61 = vadd.f32 %v4195_v25, %v6083_v15  ;;  %v5206_v15 = vld [vmem:[#allocation7 + $0x60] sm:$0xff]  }
 0x177   :  { %v4805_v16 = vpop.f32.mrf.mxu0 }
 0x178   :  { %v397_v48 = vadd.f32 %v4805_v16, %v4195_v25  ;;  %v6121_v1 = vpack.c.bf16 %v438_v60, %v437_v63  ;;  %v436_v2 = vmax.f32 %v376_v61, 0.0  ;;  %v5207_v16 = vld [vmem:[#allocation7 + $0x70] sm:$0xff]   ;;  %v5223_v61 = vld [vmem:[%s6666_s14 + $0x10] sm:$0xff]  }
 0x179   :  { %v388_v17 = vpop.f32.mrf.mxu0 }
 0x17a   :  { %v441_v53 = vmax.f32 %v397_v48, 0.0  ;;  %v389_v54 = vadd.f32 %v4195_v25, %v388_v17  ;;  %v6127_v4 = vpack.c.bf16 %v436_v2, %v435_v3  ;;  %v5208_v17 = vld [vmem:[#allocation7 + $0x68] sm:$0xff]   ;;  %v5215_v48 = vld [vmem:[%s6666_s14 + $0x30] sm:$0xff]  }
 0x17b   :  { %v4806_v18 = vpop.f32.mrf.mxu0  ;;  %v5226_v2 = vld [vmem:[%s6666_s14 + $0x40] sm:$0xff]  }
 0x17c   :  { %v400_v45 = vadd.f32 %v4806_v18, %v4195_v25  ;;  %v439_v59 = vmax.f32 %v389_v54, 0.0  ;;  %v5209_v18 = vld [vmem:[#allocation7 + $0x78] sm:$0xff]   ;;  %v5218_v54 = vld [vmem:[%s6666_s14 + $0x60] sm:$0xff]  }
 0x17d   :  { %v391_v19 = vpop.f32.mrf.mxu0 }
 0x17e   :  { %v442_v50 = vmax.f32 %v400_v45, 0.0  ;;  %v392_v51 = vadd.f32 %v4195_v25, %v391_v19  ;;  %v5210_v19 = vld [vmem:[#allocation7 + $0x80] sm:$0xff]  }
 0x17f   :  { %v4809_v20 = vpop.f32.mrf.mxu0  ;;  %v5213_v45 = vld [vmem:[%s6666_s14 + $0x38] sm:$0xff]  }
 0x180   :  { %v413_v36 = vadd.f32 %v4809_v20, %v4195_v25  ;;  %v6107_v56 = vpack.c.bf16 %v442_v50, %v441_v53  ;;  %v440_v57 = vmax.f32 %v392_v51, 0.0  ;;  %v5211_v20 = vld [vmem:[#allocation7 + $0x88] sm:$0xff]   ;;  %v5216_v50 = vld [vmem:[%s6666_s14 + $0x68] sm:$0xff]  }
 0x181   :  { %v404_v21 = vpop.f32.mrf.mxu0  ;;  %v5217_v53 = vld [vmem:[%s6666_s14 + $0x28] sm:$0xff]  }
 0x182   :  { %v445_v43 = vmax.f32 %v413_v36, 0.0  ;;  %v405_v44 = vadd.f32 %v4195_v25, %v404_v21  ;;  %v6114_v62 = vpack.c.bf16 %v440_v57, %v439_v59  ;;  %v5220_v57 = vld [vmem:[%s6666_s14 + $0x58] sm:$0xff]   ;;  %v5222_v59 = vld [vmem:[%s6666_s14 + $0x50] sm:$0xff]  }
 0x183   :  { %v4810_v22 = vpop.f32.mrf.mxu0 }
 0x184   :  { %v416_v32 = vadd.f32 %v4810_v22, %v4195_v25  ;;  %v443_v49 = vmax.f32 %v405_v44, 0.0  ;;  %v5212_v44 = vld [vmem:[%s6666_s14 + $0x78] sm:$0xff]  }
 0x185   :  { %v407_v23 = vpop.f32.mrf.mxu0 }
 0x186   :  { %v446_v40 = vmax.f32 %v416_v32, 0.0  ;;  %v408_v41 = vadd.f32 %v4195_v25, %v407_v23 }
 0x187   :  { %v4813_v24 = vpop.f32.mrf.mxu0 }
 0x188   :  { %v429_v27 = vadd.f32 %v4813_v24, %v4195_v25  ;;  %v6095_v46 = vpack.c.bf16 %v446_v40, %v445_v43  ;;  %v444_v47 = vmax.f32 %v408_v41, 0.0 }
 0x189   :  { %v420_v26 = vpop.f32.mrf.mxu0 }
 0x18a   :  { %v421_v29 = vadd.f32 %v4195_v25, %v420_v26  ;;  %v449_v33 = vmax.f32 %v429_v27, 0.0  ;;  %v6101_v52 = vpack.c.bf16 %v444_v47, %v443_v49 }
 0x18b   :  { %v4814_v28 = vpop.f32.mrf.mxu0 }
 0x18c   :  { %v432_v30 = vadd.f32 %v4814_v28, %v4195_v25  ;;  %v447_v37 = vmax.f32 %v421_v29, 0.0 }
 0x18d   :  { %v423_v31 = vpop.f32.mrf.mxu0 }
 0x18e   :  { %v450_v34 = vmax.f32 %v432_v30, 0.0  ;;  %v424_v35 = vadd.f32 %v4195_v25, %v423_v31 }
 0x190   :  { %v6085_v38 = vpack.c.bf16 %v450_v34, %v449_v33  ;;  %v448_v39 = vmax.f32 %v424_v35, 0.0 }
 0x192   :  { %v6087_v42 = vpack.c.bf16 %v448_v39, %v447_v37  ;;  %4815 = vmatprep.subr.bf16.mxu1 %v6085_v38  ;;  %4835 = vmatprep.subr.bf16.mxu0 %v6085_v38 }
 0x193   :  { %4816 = vmatpush3.bf16.msra.mxu1 %v6085_v38  ;;  %4836 = vmatpush3.bf16.msra.mxu0 %v6085_v38 }
 0x194   :  { %4817 = vmatprep.subr.bf16.mxu1 %v6087_v42  ;;  %4837 = vmatprep.subr.bf16.mxu0 %v6087_v42 }
 0x197   :  { %4818 = vmatpush3.bf16.msra.mxu1 %v6087_v42  ;;  %4838 = vmatpush3.bf16.msra.mxu0 %v6087_v42 }
 0x198   :  { %4819 = vmatprep.subr.bf16.mxu1 %v6095_v46  ;;  %4839 = vmatprep.subr.bf16.mxu0 %v6095_v46 }
 0x19b   :  { %4820 = vmatpush3.bf16.msra.mxu1 %v6095_v46  ;;  %4840 = vmatpush3.bf16.msra.mxu0 %v6095_v46 }
 0x19c   :  { %4821 = vmatprep.subr.bf16.mxu1 %v6101_v52  ;;  %4841 = vmatprep.subr.bf16.mxu0 %v6101_v52 }
 0x19f   :  { %4822 = vmatpush3.bf16.msra.mxu1 %v6101_v52  ;;  %4842 = vmatpush3.bf16.msra.mxu0 %v6101_v52 }
 0x1a0   :  { %4823 = vmatprep.subr.bf16.mxu1 %v6107_v56  ;;  %4843 = vmatprep.subr.bf16.mxu0 %v6107_v56 }
 0x1a3   :  { %4824 = vmatpush3.bf16.msra.mxu1 %v6107_v56  ;;  %4844 = vmatpush3.bf16.msra.mxu0 %v6107_v56 }
 0x1a4   :  { %4825 = vmatprep.subr.bf16.mxu1 %v6114_v62  ;;  %4845 = vmatprep.subr.bf16.mxu0 %v6114_v62 }
 0x1a7   :  { %4826 = vmatpush3.bf16.msra.mxu1 %v6114_v62  ;;  %4846 = vmatpush3.bf16.msra.mxu0 %v6114_v62 }
 0x1a8   :  { %4827 = vmatprep.subr.bf16.mxu1 %v6121_v1  ;;  %4847 = vmatprep.subr.bf16.mxu0 %v6121_v1 }
 0x1ab   :  { %4828 = vmatpush3.bf16.msra.mxu1 %v6121_v1  ;;  %4848 = vmatpush3.bf16.msra.mxu0 %v6121_v1 }
 0x1ac   :  { %4829 = vmatprep.subr.bf16.mxu1 %v6127_v4  ;;  %4849 = vmatprep.subr.bf16.mxu0 %v6127_v4 }
 0x1af   :  { %4830 = vmatpush3.bf16.msra.mxu1 %v6127_v4  ;;  %4850 = vmatpush3.bf16.msra.mxu0 %v6127_v4 }
 0x1b0   :  { %4855 = vmatprep.subr.bf16.mxu1 %v6085_v38  ;;  %4875 = vmatprep.subr.bf16.mxu0 %v6085_v38 }
 0x1b2   :  { %4832 = vmatmul.mubr.bf16.vlgmr.msra.gmra.mxu1 %v5196_v5  ;;  %4852 = vmatmul.mubr.bf16.vlgmr.msra.gmra.mxu0 %v5197_v6 }
 0x1b3   :  { %4856 = vmatpush3.bf16.msra.mxu1 %v6085_v38  ;;  %4876 = vmatpush3.bf16.msra.mxu0 %v6085_v38 }
 0x1b4   :  { %4857 = vmatprep.subr.bf16.mxu1 %v6087_v42  ;;  %4877 = vmatprep.subr.bf16.mxu0 %v6087_v42 }
 0x1b5   :  { %4871 = vmatprep.mubr.bf16.mxu1 %v5198_v7  ;;  %4891 = vmatprep.mubr.bf16.mxu0 %v5199_v8 }
 0x1b7   :  { %4858 = vmatpush3.bf16.msra.mxu1 %v6087_v42  ;;  %4878 = vmatpush3.bf16.msra.mxu0 %v6087_v42 }
 0x1b8   :  { %4859 = vmatprep.subr.bf16.mxu1 %v6095_v46  ;;  %4879 = vmatprep.subr.bf16.mxu0 %v6095_v46 }
 0x1bb   :  { %4860 = vmatpush3.bf16.msra.mxu1 %v6095_v46  ;;  %4880 = vmatpush3.bf16.msra.mxu0 %v6095_v46 }
 0x1bc   :  { %4861 = vmatprep.subr.bf16.mxu1 %v6101_v52  ;;  %4881 = vmatprep.subr.bf16.mxu0 %v6101_v52 }
 0x1bf   :  { %4862 = vmatpush3.bf16.msra.mxu1 %v6101_v52  ;;  %4882 = vmatpush3.bf16.msra.mxu0 %v6101_v52 }
 0x1c0   :  { %4863 = vmatprep.subr.bf16.mxu1 %v6107_v56  ;;  %4883 = vmatprep.subr.bf16.mxu0 %v6107_v56 }
 0x1c3   :  { %4864 = vmatpush3.bf16.msra.mxu1 %v6107_v56  ;;  %4884 = vmatpush3.bf16.msra.mxu0 %v6107_v56 }
 0x1c4   :  { %4865 = vmatprep.subr.bf16.mxu1 %v6114_v62  ;;  %4885 = vmatprep.subr.bf16.mxu0 %v6114_v62 }
 0x1c7   :  { %4866 = vmatpush3.bf16.msra.mxu1 %v6114_v62  ;;  %4886 = vmatpush3.bf16.msra.mxu0 %v6114_v62 }
 0x1c8   :  { %4867 = vmatprep.subr.bf16.mxu1 %v6121_v1  ;;  %4887 = vmatprep.subr.bf16.mxu0 %v6121_v1 }
 0x1cb   :  { %4868 = vmatpush3.bf16.msra.mxu1 %v6121_v1  ;;  %4888 = vmatpush3.bf16.msra.mxu0 %v6121_v1 }
 0x1cc   :  { %4869 = vmatprep.subr.bf16.mxu1 %v6127_v4  ;;  %4889 = vmatprep.subr.bf16.mxu0 %v6127_v4 }
 0x1cf   :  { %4870 = vmatpush3.bf16.msra.mxu1 %v6127_v4  ;;  %4890 = vmatpush3.bf16.msra.mxu0 %v6127_v4 }
 0x1d0   :  { %4895 = vmatprep.subr.bf16.mxu1 %v6085_v38  ;;  %4915 = vmatprep.subr.bf16.mxu0 %v6085_v38 }
 0x1d2   :  { %4872 = vmatmul.mubr.bf16.vlgmr.msra.gmra.mxu1 %v5200_v9  ;;  %4892 = vmatmul.mubr.bf16.vlgmr.msra.gmra.mxu0 %v5201_v10 }
 0x1d3   :  { %4896 = vmatpush3.bf16.msra.mxu1 %v6085_v38  ;;  %4916 = vmatpush3.bf16.msra.mxu0 %v6085_v38 }
 0x1d4   :  { %4897 = vmatprep.subr.bf16.mxu1 %v6087_v42  ;;  %4917 = vmatprep.subr.bf16.mxu0 %v6087_v42 }
 0x1d5   :  { %4911 = vmatprep.mubr.bf16.mxu1 %v5202_v11  ;;  %4931 = vmatprep.mubr.bf16.mxu0 %v5203_v12 }
 0x1d7   :  { %4898 = vmatpush3.bf16.msra.mxu1 %v6087_v42  ;;  %4918 = vmatpush3.bf16.msra.mxu0 %v6087_v42 }
 0x1d8   :  { %4899 = vmatprep.subr.bf16.mxu1 %v6095_v46  ;;  %4919 = vmatprep.subr.bf16.mxu0 %v6095_v46 }
 0x1db   :  { %4900 = vmatpush3.bf16.msra.mxu1 %v6095_v46  ;;  %4920 = vmatpush3.bf16.msra.mxu0 %v6095_v46 }
 0x1dc   :  { %4901 = vmatprep.subr.bf16.mxu1 %v6101_v52  ;;  %4921 = vmatprep.subr.bf16.mxu0 %v6101_v52 }
 0x1df   :  { %4902 = vmatpush3.bf16.msra.mxu1 %v6101_v52  ;;  %4922 = vmatpush3.bf16.msra.mxu0 %v6101_v52 }
 0x1e0   :  { %4903 = vmatprep.subr.bf16.mxu1 %v6107_v56  ;;  %4923 = vmatprep.subr.bf16.mxu0 %v6107_v56 }
 0x1e3   :  { %4904 = vmatpush3.bf16.msra.mxu1 %v6107_v56  ;;  %4924 = vmatpush3.bf16.msra.mxu0 %v6107_v56 }
 0x1e4   :  { %4905 = vmatprep.subr.bf16.mxu1 %v6114_v62  ;;  %4925 = vmatprep.subr.bf16.mxu0 %v6114_v62 }
 0x1e7   :  { %4906 = vmatpush3.bf16.msra.mxu1 %v6114_v62  ;;  %4926 = vmatpush3.bf16.msra.mxu0 %v6114_v62 }
 0x1e8   :  { %4907 = vmatprep.subr.bf16.mxu1 %v6121_v1  ;;  %4927 = vmatprep.subr.bf16.mxu0 %v6121_v1 }
 0x1eb   :  { %4908 = vmatpush3.bf16.msra.mxu1 %v6121_v1  ;;  %4928 = vmatpush3.bf16.msra.mxu0 %v6121_v1 }
 0x1ec   :  { %4909 = vmatprep.subr.bf16.mxu1 %v6127_v4  ;;  %4929 = vmatprep.subr.bf16.mxu0 %v6127_v4 }
 0x1ef   :  { %4910 = vmatpush3.bf16.msra.mxu1 %v6127_v4  ;;  %4930 = vmatpush3.bf16.msra.mxu0 %v6127_v4 }
 0x1f0   :  { %4935 = vmatprep.subr.bf16.mxu1 %v6085_v38  ;;  %4955 = vmatprep.subr.bf16.mxu0 %v6085_v38 }
 0x1f2   :  { %4912 = vmatmul.mubr.bf16.vlgmr.msra.gmra.mxu1 %v5204_v13  ;;  %4932 = vmatmul.mubr.bf16.vlgmr.msra.gmra.mxu0 %v5205_v14  ;;  %v6333_v13 = vld [vmem:[%s6666_s14 + $0x88] sm:$0xff]  }
 0x1f3   :  { %4936 = vmatpush3.bf16.msra.mxu1 %v6085_v38  ;;  %4956 = vmatpush3.bf16.msra.mxu0 %v6085_v38 }
 0x1f4   :  { %4937 = vmatprep.subr.bf16.mxu1 %v6087_v42  ;;  %4957 = vmatprep.subr.bf16.mxu0 %v6087_v42 }
 0x1f5   :  { %4951 = vmatprep.mubr.bf16.mxu1 %v5206_v15  ;;  %4971 = vmatprep.mubr.bf16.mxu0 %v5207_v16 }
 0x1f7   :  { %4938 = vmatpush3.bf16.msra.mxu1 %v6087_v42  ;;  %4958 = vmatpush3.bf16.msra.mxu0 %v6087_v42 }
 0x1f8   :  { %4939 = vmatprep.subr.bf16.mxu1 %v6095_v46  ;;  %4959 = vmatprep.subr.bf16.mxu0 %v6095_v46 }
 0x1fb   :  { %4940 = vmatpush3.bf16.msra.mxu1 %v6095_v46  ;;  %4960 = vmatpush3.bf16.msra.mxu0 %v6095_v46 }
 0x1fc   :  { %4941 = vmatprep.subr.bf16.mxu1 %v6101_v52  ;;  %4961 = vmatprep.subr.bf16.mxu0 %v6101_v52 }
 0x1ff   :  { %4942 = vmatpush3.bf16.msra.mxu1 %v6101_v52  ;;  %4962 = vmatpush3.bf16.msra.mxu0 %v6101_v52 }
 0x200   :  { %4943 = vmatprep.subr.bf16.mxu1 %v6107_v56  ;;  %4963 = vmatprep.subr.bf16.mxu0 %v6107_v56 }
 0x203   :  { %4944 = vmatpush3.bf16.msra.mxu1 %v6107_v56  ;;  %4964 = vmatpush3.bf16.msra.mxu0 %v6107_v56 }
 0x204   :  { %4945 = vmatprep.subr.bf16.mxu1 %v6114_v62  ;;  %4965 = vmatprep.subr.bf16.mxu0 %v6114_v62 }
 0x207   :  { %4946 = vmatpush3.bf16.msra.mxu1 %v6114_v62  ;;  %4966 = vmatpush3.bf16.msra.mxu0 %v6114_v62 }
 0x208   :  { %4947 = vmatprep.subr.bf16.mxu1 %v6121_v1  ;;  %4967 = vmatprep.subr.bf16.mxu0 %v6121_v1 }
 0x20b   :  { %4948 = vmatpush3.bf16.msra.mxu1 %v6121_v1  ;;  %4968 = vmatpush3.bf16.msra.mxu0 %v6121_v1 }
 0x20c   :  { %4949 = vmatprep.subr.bf16.mxu1 %v6127_v4  ;;  %4969 = vmatprep.subr.bf16.mxu0 %v6127_v4 }
 0x20f   :  { %4950 = vmatpush3.bf16.msra.mxu1 %v6127_v4  ;;  %4970 = vmatpush3.bf16.msra.mxu0 %v6127_v4 }
 0x210   :  { %4975 = vmatprep.subr.bf16.mxu1 %v6085_v38  ;;  %4621 = vmatprep.subr.bf16.mxu0 %v5212_v44 }
 0x212   :  { %4952 = vmatmul.mubr.bf16.vlgmr.msra.gmra.mxu1 %v5208_v17  ;;  %4972 = vmatmul.mubr.bf16.vlgmr.msra.gmra.mxu0 %v5209_v18 }
 0x213   :  { %4976 = vmatpush3.bf16.msra.mxu1 %v6085_v38  ;;  %4991 = vmatprep.mubr.bf16.mxu1 %v5210_v19 }
 0x214   :  { %4977 = vmatprep.subr.bf16.mxu1 %v6087_v42  ;;  %4622 = vmatpush3.bf16.msra.mxu0 %v5213_v45 }
 0x217   :  { %4978 = vmatpush3.bf16.msra.mxu1 %v6087_v42 }
 0x218   :  { %4979 = vmatprep.subr.bf16.mxu1 %v6095_v46 }
 0x21b   :  { %4980 = vmatpush3.bf16.msra.mxu1 %v6095_v46  ;;  %v5214_v46 = vld [vmem:[%s6666_s14 + $0x70] sm:$0xff]  }
 0x21c   :  { %4981 = vmatprep.subr.bf16.mxu1 %v6101_v52  ;;  %4623 = vmatprep.subr.bf16.mxu0 %v5214_v46 }
 0x21d   :  { %4624 = vmatpush3.bf16.msra.mxu0 %v5215_v48 }
 0x21e   :  { %4625 = vmatprep.subr.bf16.mxu0 %v5216_v50 }
 0x21f   :  { %4982 = vmatpush3.bf16.msra.mxu1 %v6101_v52 }
 0x220   :  { %4983 = vmatprep.subr.bf16.mxu1 %v6107_v56 }
 0x221   :  { %4626 = vmatpush3.bf16.msra.mxu0 %v5217_v53 }
 0x222   :  { %4627 = vmatprep.subr.bf16.mxu0 %v5218_v54 }
 0x223   :  { %4984 = vmatpush3.bf16.msra.mxu1 %v6107_v56  ;;  %v5219_v56 = vld [vmem:[%s6666_s14 + $0x20] sm:$0xff]  }
 0x224   :  { %4985 = vmatprep.subr.bf16.mxu1 %v6114_v62 }
 0x225   :  { %4628 = vmatpush3.bf16.msra.mxu0 %v5219_v56 }
 0x226   :  { %4629 = vmatprep.subr.bf16.mxu0 %v5220_v57 }
 0x227   :  { %4986 = vmatpush3.bf16.msra.mxu1 %v6114_v62  ;;  %v5224_v62 = vld [vmem:[%s6666_s14 + $0x48] sm:$0xff]  }
 0x228   :  { %4987 = vmatprep.subr.bf16.mxu1 %v6121_v1 }
 0x229   :  { %4630 = vmatpush3.bf16.msra.mxu0 %v5221_v58 }
 0x22a   :  { %4631 = vmatprep.subr.bf16.mxu0 %v5222_v59 }
 0x22b   :  { %4988 = vmatpush3.bf16.msra.mxu1 %v6121_v1  ;;  %v5225_v1 = vld [vmem:[%s6666_s14 + $0x8] sm:$0xff]  }
 0x22c   :  { %4989 = vmatprep.subr.bf16.mxu1 %v6127_v4 }
 0x22d   :  { %4632 = vmatpush3.bf16.msra.mxu0 %v5223_v61 }
 0x22e   :  { %4633 = vmatprep.subr.bf16.mxu0 %v5224_v62 }
 0x22f   :  { %4990 = vmatpush3.bf16.msra.mxu1 %v6127_v4  ;;  %v5227_v4 = vld [vmem:[%s6666_s14] sm:$0xff]  }
 0x231   :  { %4634 = vmatpush3.bf16.msra.mxu0 %v5225_v1 }
 0x232   :  { %4992 = vmatmul.mubr.bf16.vlgmr.msra.gmra.mxu1 %v5211_v20  ;;  %4635 = vmatprep.subr.bf16.mxu0 %v5226_v2 }
 0x235   :  { %4636 = vmatpush3.bf16.msra.mxu0 %v5227_v4 }
 0x236   :  { %4995 = vmatprep.subr.bf16.mxu0 %v6333_v13 }
 0x272   :  { %v6247_v21 = vpop.f32.mrf.mxu0  ;;  %v6254_v27 = vpop.f32.mrf.mxu1 }
 0x274   :  { %v575_v22 = vpop.f32.mrf.mxu0  ;;  %v6256_v28 = vpop.f32.mrf.mxu1 }
 0x276   :  { %v6249_v23 = vpop.f32.mrf.mxu0  ;;  %v6258_v29 = vpop.f32.mrf.mxu1 }
 0x277   :  { %v5144_v24 = vpack.i.bf16 %v6249_v23, %v6247_v21 }
 0x278   :  { %v578_v25 = vpop.f32.mrf.mxu0  ;;  %v6260_v30 = vpop.f32.mrf.mxu1 }
 0x279   :  { %v5114_v26 = vpack.i.bf16 %v578_v25, %v575_v22 }
 0x27b   :  { %5115 = vrot.lane.b32.xlu0 %v5114_v26, %s5874_s11 }
 0x292   :  { %v6262_v31 = vpop.f32.mrf.mxu1  ;;  %v6264_v32 = vpop.f32.mrf.mxu0 }
 0x294   :  { %v641_v33 = vpop.f32.mrf.mxu1  ;;  %v707_v34 = vpop.f32.mrf.mxu0 }
 0x296   :  { %v6266_v35 = vpop.f32.mrf.mxu1  ;;  %v6268_v36 = vpop.f32.mrf.mxu0 }
 0x297   :  { %v5159_v37 = vpack.i.bf16 %v6266_v35, %v6262_v31  ;;  %v5169_v38 = vpack.i.bf16 %v6268_v36, %v6264_v32 }
 0x298   :  { %v644_v39 = vpop.f32.mrf.mxu1  ;;  %v710_v41 = vpop.f32.mrf.mxu0 }
 0x299   :  { %v5119_v40 = vpack.i.bf16 %v644_v39, %v641_v33  ;;  %v5124_v42 = vpack.i.bf16 %v710_v41, %v707_v34 }
 0x29b   :  { %5120 = vrot.lane.b32.xlu1 %v5119_v40, %s5866_s6 }
 0x29f   :  { %5125 = vrot.lane.b32.xlu1 %v5124_v42, %s5875_s26 }
 0x2b2   :  { %v4933_v43 = vpop.f32.mrf.mxu0  ;;  %v6311_v60 = vpop.f32.mrf.mxu1 }
 0x2b4   :  { %v839_v47 = vpop.f32.mrf.mxu0  ;;  %v773_v63 = vpop.f32.mrf.mxu1 }
 0x2b6   :  { %v4934_v49 = vpop.f32.mrf.mxu0  ;;  %v6319_v0 = vpop.f32.mrf.mxu1 }
 0x2b7   :  { %v5129_v51 = vpack.i.bf16 %v4934_v49, %v4933_v43 }
 0x2b8   :  { %v842_v52 = vpop.f32.mrf.mxu0  ;;  %v776_v3 = vpop.f32.mrf.mxu1 }
 0x2b9   :  { %5130 = vrot.lane.b32.xlu0 %v5129_v51, %s5874_s11  ;;  %v5134_v55 = vpack.i.bf16 %v842_v52, %v839_v47 }
 0x2bd   :  { %5135 = vrot.lane.b32.xlu0 %v5134_v55, %s5874_s11 }
 0x2d2   :  { %v4953_v5 = vpop.f32.mrf.mxu1  ;;  %v4973_v6 = vpop.f32.mrf.mxu0 }
 0x2d4   :  { %v905_v7 = vpop.f32.mrf.mxu1  ;;  %v971_v8 = vpop.f32.mrf.mxu0 }
 0x2d6   :  { %v4954_v9 = vpop.f32.mrf.mxu1  ;;  %v4974_v10 = vpop.f32.mrf.mxu0 }
 0x2d7   :  { %v5154_v16 = vpack.i.bf16 %v4954_v9, %v4953_v5  ;;  %v5164_v17 = vpack.i.bf16 %v4974_v10, %v4973_v6 }
 0x2d8   :  { %v908_v11 = vpop.f32.mrf.mxu1  ;;  %v974_v12 = vpop.f32.mrf.mxu0 }
 0x2d9   :  { %v5139_v14 = vpack.i.bf16 %v908_v11, %v905_v7  ;;  %v5149_v15 = vpack.i.bf16 %v974_v12, %v971_v8 }
 0x2db   :  { %5150 = vrot.lane.b32.xlu0 %v5149_v15, %s5875_s26  ;;  %5140 = vrot.lane.b32.xlu1 %v5139_v14, %s5866_s6 }
 0x2df   :  { %5155 = vrot.lane.b32.xlu0 %v5154_v16, %s5866_s6  ;;  %5145 = vrot.lane.b32.xlu1 %v5144_v24, %s5874_s11  ;;  %s5881_s11 = smov [#allocation23]  }
 0x2e3   :  { %5165 = vrot.lane.b32.xlu0 %v5164_v17, %s5875_s26  ;;  %5160 = vrot.lane.b32.xlu1 %v5159_v37, %s5866_s6 }
 0x2e7   :  { %5170 = vrot.lane.b32.xlu1 %v5169_v38, %s5875_s26  ;;  %s4180_s26 = sshll.u32 %s5881_s11, 4  ;;  %s4181_s26 = int_to_ptr.vmem [resolvable:$true] %s4180_s26 }
 0x2e8   :  { %p5824_p10 = scmp.lt.s32.totalorder %s4181_s26, %s4181_s26 }
 0x2ed   :  { %v5116_v18 = vpop.permute.xlu0 %5115 }
 0x2ee   :  { %v5118_v25 = vunpack.i.h.bf16 %v5116_v18  ;;  %v5117_v21 = vunpack.i.l.bf16 %v5116_v18 }
 0x2f0   :  { %v1148_v32 = vsel %vm313_vm0, %v6256_v28, %v5117_v21  ;;  %v1149_v36 = vsel %vm313_vm0, %v6260_v30, %v5118_v25 }
 0x2f2   :  { %v6352_v35 = vpop.f32.mrf.mxu1 }
 0x2f4   :  { %v1037_v50 = vpop.f32.mrf.mxu1 }
 0x2f6   :  { %v4994_v62 = vpop.f32.mrf.mxu1 }
 0x2f8   :  { %v1040_v16 = vpop.f32.mrf.mxu1 }
 0x2f9   :  { %v1176_v25 = vpack.c.bf16 %v1040_v16, %v1037_v50  ;;  %v5236_v16 = vld [vmem:[%s6640_s8 + $0x60] sm:$0xff]  }
 0x30d   :  { %v5121_v20 = vpop.permute.xlu1 %5120 }
 0x30e   :  { %v5123_v24 = vunpack.i.h.bf16 %v5121_v20  ;;  %v5122_v26 = vunpack.i.l.bf16 %v5121_v20 }
 0x310   :  { %v1154_v44 = vsel %vm1152_vm1, %v1149_v36, %v5123_v24  ;;  %v1153_v45 = vsel %vm1152_vm1, %v1148_v32, %v5122_v26 }
 0x311   :  { %v5126_v23 = vpop.permute.xlu1 %5125 }
 0x312   :  { %v5128_v39 = vunpack.i.h.bf16 %v5126_v23  ;;  %v5127_v31 = vunpack.i.l.bf16 %v5126_v23 }
 0x314   :  { %v1158_v28 = vsel %vm1157_vm2, %v1153_v45, %v5127_v31  ;;  %v1159_v48 = vsel %vm1157_vm2, %v1154_v44, %v5128_v39 }
 0x315   :  { %v1174_v61 = vpack.c.bf16 %v1159_v48, %v1158_v28 }
 0x32b   :  { %v5131_v19 = vpop.permute.xlu0 %5130 }
 0x32c   :  { %v5133_v51 = vunpack.i.h.bf16 %v5131_v19  ;;  %v5132_v52 = vunpack.i.l.bf16 %v5131_v19 }
 0x32e   :  { %v1164_v1 = vsel %vm313_vm0, %v6311_v60, %v5132_v52  ;;  %v1165_v2 = vsel %vm313_vm0, %v6319_v0, %v5133_v51 }
 0x32f   :  { %v5136_v22 = vpop.permute.xlu0 %5135 }
 0x330   :  { %v5138_v33 = vunpack.i.h.bf16 %v5136_v22  ;;  %v5137_v34 = vunpack.i.l.bf16 %v5136_v22 }
 0x332   :  { %v1162_v46 = vsel %vm313_vm0, %v773_v63, %v5137_v34  ;;  %v1163_v47 = vsel %vm313_vm0, %v776_v3, %v5138_v33  ;;  %v5229_v63 = vld [vmem:[%s6666_s14 + $0x80] sm:$0xff]   ;;  %s5819_s14 = scalar_lea.vmem %s4181_s26, 32 }
 0x333   :  { %p5820_p9 = scmp.ne.s32.totalorder %s4181_s26, %s5819_s14  ;;  %p5825_p11 = scmp.lt.s32.totalorder %s5819_s14, %s5819_s14 }
 0x335   :  { %p5826_p12 = por %p5825_p11, %p5824_p10 }
 0x337   :  { %p5827_p13 = pnand %p5826_p12, %p5820_p9 }
 0x34d   :  { %v5151_v37 = vpop.permute.xlu0 %5150  ;;  %v5141_v38 = vpop.permute.xlu1 %5140 }
 0x34e   :  { %v5153_v40 = vunpack.i.h.bf16 %v5151_v37  ;;  %v5152_v41 = vunpack.i.l.bf16 %v5151_v37  ;;  %v5143_v42 = vunpack.i.h.bf16 %v5141_v38  ;;  %v5142_v43 = vunpack.i.l.bf16 %v5141_v38 }
 0x350   :  { %v1167_v30 = vsel %vm1152_vm1, %v1163_v47, %v5143_v42  ;;  %v1166_v49 = vsel %vm1152_vm1, %v1162_v46, %v5142_v43 }
 0x351   :  { %v5156_v53 = vpop.permute.xlu0 %5155  ;;  %v5146_v54 = vpop.permute.xlu1 %5145  ;;  %v1170_v55 = vsel %vm1157_vm2, %v1166_v49, %v5152_v41  ;;  %v1171_v56 = vsel %vm1157_vm2, %v1167_v30, %v5153_v40  ;;  %v4232_v40 = vld [vmem:[#allocation8] ss:$0 sm:$0xff] }
 0x352   :  { %v5158_v57 = vunpack.i.h.bf16 %v5156_v53  ;;  %v5157_v58 = vunpack.i.l.bf16 %v5156_v53  ;;  %v1175_v59 = vpack.c.bf16 %v1171_v56, %v1170_v55  ;;  %v5148_v5 = vunpack.i.h.bf16 %v5146_v54 }
 0x353   :  { %v5147_v6 = vunpack.i.l.bf16 %v5146_v54 }
 0x354   :  { %1369 = vmatprep.mubr.bf16.mxu0 %v1175_v59  ;;  %v1169_v9 = vsel %vm1152_vm1, %v1165_v2, %v5158_v57  ;;  %v1168_v10 = vsel %vm1152_vm1, %v1164_v1, %v5157_v58  ;;  %v1151_v17 = vsel %vm313_vm0, %v6258_v29, %v5148_v5  ;;  %v1179_v29 = vpack.c.bf16 %v4994_v62, %v6352_v35  ;;  %v4254_v59 = vld [vmem:[%s6639_s7 + $0x4] sm:$0xf]  ;;  %v4258_v62 = vld [vmem:[%s6639_s7 + $0xc] sm:$0xf]  ;;  %v4262_v1 = vld [vmem:[%s6639_s7 + $0x14] sm:$0xf] }
 0x355   :  { %v5166_v3 = vpop.permute.xlu0 %5165  ;;  %v5161_v4 = vpop.permute.xlu1 %5160  ;;  %1370 = vmatmul.mubr.bf16.vlgmr.msra.gmra.mxu0 %v1174_v61  ;;  %v1150_v18 = vsel %vm313_vm0, %v6254_v27, %v5147_v6  ;;  %v5876_v27 = vmov 0.0   ;;  %v1441_v61 = vld [vmem:[%s6639_s7] sm:$0xf]  ;;  %v4260_v2 = vld [vmem:[%s6639_s7 + $0x10] sm:$0xf]  ;;  %v5230_v6 = vld [vmem:[%s6640_s8 + $0x78] sm:$0xff]  }
 0x356   :  { %v5168_v7 = vunpack.i.h.bf16 %v5166_v3  ;;  %v5167_v8 = vunpack.i.l.bf16 %v5166_v3  ;;  %v5163_v11 = vunpack.i.h.bf16 %v5161_v4  ;;  %v5162_v12 = vunpack.i.l.bf16 %v5161_v4  ;;  %4996 = vmatpush3.bf16.msra.mxu0 %v6333_v13  ;;  %5003 = vmatprep.subr.bf16.mxu1 %v5876_v27  ;;  %v4266_v3 = vld [vmem:[%s6639_s7 + $0x1c] sm:$0xf]  ;;  %v4264_v4 = vld [vmem:[%s6639_s7 + $0x18] sm:$0xf]  ;;  %v4268_v5 = vld [vmem:[%s6639_s7 + $0x20] sm:$0xf] }
 0x357   :  { %4997 = vmatprep.subr.bf16.mxu0 %v5229_v63  ;;  %5007 = vmatprep.mubr.msk.bf16.mxu1 %vm5877_vm3, %v5876_v27 }
 0x358   :  { %v1172_v60 = vsel %vm1157_vm2, %v1168_v10, %v5167_v8  ;;  %v1173_v0 = vsel %vm1157_vm2, %v1169_v9, %v5168_v7  ;;  %v1155_v22 = vsel %vm1152_vm1, %v1150_v18, %v5162_v12  ;;  %v1156_v13 = vsel %vm1152_vm1, %v1151_v17, %v5163_v11  ;;  %v5231_v7 = vld [vmem:[%s6640_s8 + $0x38] sm:$0xff]   ;;  %v5232_v8 = vld [vmem:[%s6640_s8 + $0x70] sm:$0xff]   ;;  %v5234_v12 = vld [vmem:[%s6640_s8 + $0x68] sm:$0xff]  }
 0x359   :  { %v5171_v14 = vpop.permute.xlu1 %5170  ;;  %v1178_v15 = vpack.c.bf16 %v1173_v0, %v1172_v60  ;;  %v5233_v9 = vld [vmem:[%s6640_s8 + $0x30] sm:$0xff]   ;;  %v5239_v10 = vld [vmem:[%s6640_s8 + $0xf8] sm:$0xff]   ;;  %v5237_v17 = vld [vmem:[%s6640_s8 + $0x20] sm:$0xff]  }
 0x35a   :  { %v5173_v19 = vunpack.i.h.bf16 %v5171_v14  ;;  %v5172_v20 = vunpack.i.l.bf16 %v5171_v14  ;;  %4998 = vmatpush3.bf16.msra.mxu0 %v5229_v63  ;;  %v4256_v63 = vld [vmem:[%s6639_s7 + $0x8] sm:$0xf]  ;;  %v5241_v11 = vld [vmem:[%s6640_s8 + $0xb8] sm:$0xff]   ;;  %v5243_v60 = vld [vmem:[%s6640_s8 + $0xf0] sm:$0xff]  }
 0x35b   :  { %1377 = vmatprep.mubr.bf16.mxu0 %v1178_v15  ;;  %5011 = vmatprep.subr.bf16.mxu0 %v5876_v27  ;;  %v5245_v0 = vld [vmem:[%s6640_s8 + $0xb0] sm:$0xff]   ;;  %v5235_v14 = vld [vmem:[%s6640_s8 + $0x28] sm:$0xff]   ;;  %v5238_v18 = vld [vmem:[%s6640_s8 + $0x58] sm:$0xff]  }
 0x35c   :  { %v1160_v21 = vsel %vm1157_vm2, %v1155_v22, %v5172_v20  ;;  %v1161_v23 = vsel %vm1157_vm2, %v1156_v13, %v5173_v19  ;;  %v5247_v15 = vld [vmem:[%s6640_s8 + $0xe8] sm:$0xff]   ;;  %v5240_v19 = vld [vmem:[%s6640_s8 + $0x18] sm:$0xff]   ;;  %v5242_v20 = vld [vmem:[%s6640_s8 + $0x50] sm:$0xff]  }
 0x35d   :  { %v1177_v24 = vpack.c.bf16 %v1161_v23, %v1160_v21  ;;  %v5244_v22 = vld [vmem:[%s6640_s8 + $0x10] sm:$0xff]   ;;  %v5246_v13 = vld [vmem:[%s6640_s8 + $0x48] sm:$0xff]   ;;  %v5250_v23 = vld [vmem:[%s6640_s8 + $0x40] sm:$0xff]  }
 0x35e   :  { %v5249_v21 = vld [vmem:[%s6640_s8 + $0xa8] sm:$0xff]  }
 0x35f   :  { %1378 = vmatmul.mubr.bf16.gmra.mxu0 %v1177_v24  ;;  %v5251_v24 = vld [vmem:[%s6640_s8 + $0xe0] sm:$0xff]  }
 0x360   :  { %4999 = vmatprep.mubr.msk.bf16.mxu0 %vm313_vm0, %v1176_v25  ;;  %v5248_v25 = vld [vmem:[%s6640_s8 + $0x8] sm:$0xff]  }
 0x367   :  { %5000 = vmatmul.mubr.msk.bf16.vlgmr.msra.gmra.mxu0 %vm313_vm0, %v1179_v29 }
 0x368   :  { %5015 = vmatprep.mubr.msk.bf16.mxu0 %vm5877_vm3, %v5876_v27 }
 0x415   :  { %v4637_v26 = vpop.f32.mrf.mxu0 }
 0x417   :  { %v4638_v33 = vpop.f32.mrf.mxu0 }
 0x418   :  { %v4639_v42 = vadd.f32 %v4638_v33, %v4637_v26  ;;  %v5252_v33 = vld [vmem:[%s6640_s8] sm:$0xff]  }
 0x419   :  { %v4640_v34 = vpop.f32.mrf.mxu0 }
 0x41a   :  { %v1372_v48 = vadd.f32 %v4639_v42, %v4232_v40  ;;  %v5258_v42 = vld [vmem:[%s6640_s8 + $0x90] sm:$0xff]  }
 0x41b   :  { %v4641_v39 = vpop.f32.mrf.mxu0 }
 0x41c   :  { %v4642_v43 = vadd.f32 %v4641_v39, %v4640_v34  ;;  %v5253_v34 = vld [vmem:[%s6640_s8 + $0xa0] sm:$0xff]  }
 0x41e   :  { %v1375_v49 = vadd.f32 %v4642_v43, %v4232_v40 }
 0x41f   :  { %v4643_v31 = vpop.f32.mrf.mxu0 }
 0x421   :  { %v4644_v35 = vpop.f32.mrf.mxu0 }
 0x422   :  { %v4645_v36 = vadd.f32 %v4644_v35, %v4643_v31  ;;  %v5254_v35 = vld [vmem:[%s6640_s8 + $0xd8] sm:$0xff]  }
 0x423   :  { %v4646_v32 = vpop.f32.mrf.mxu0 }
 0x424   :  { %v1380_v44 = vadd.f32 %v4645_v36, %v4232_v40 }
 0x425   :  { %v4647_v37 = vpop.f32.mrf.mxu0 }
 0x426   :  { %v4648_v38 = vadd.f32 %v4647_v37, %v4646_v32  ;;  %v5255_v37 = vld [vmem:[%s6640_s8 + $0x98] sm:$0xff]  }
 0x427   :  { %v5001_v41 = vpop.f32.mrf.mxu0 }
 0x428   :  { %v1429_v46 = vadd.f32 %v5001_v41, %v1380_v44  ;;  %v1383_v47 = vadd.f32 %v4648_v38, %v4232_v40  ;;  %v5257_v38 = vld [vmem:[%s6640_s8 + $0xd0] sm:$0xff]  }
 0x429   :  { %v1420_v45 = vpop.f32.mrf.mxu0 }
 0x42a   :  { %v1437_v51 = vmax.f32 %v1429_v46, 0.0  ;;  %v1421_v52 = vadd.f32 %v1420_v45, %v1372_v48  ;;  %v5260_v46 = vld [vmem:[%s6640_s8 + $0xc8] sm:$0xff]  }
 0x42b   :  { %v5002_v28 = vpop.f32.mrf.mxu0 }
 0x42c   :  { %v1432_v30 = vadd.f32 %v5002_v28, %v1383_v47  ;;  %v1435_v57 = vmax.f32 %v1421_v52, 0.0  ;;  %v5263_v52 = vld [vmem:[%s6640_s8 + $0xc0] sm:$0xff]  }
 0x42d   :  { %v1423_v50 = vpop.f32.mrf.mxu0 }
 0x42e   :  { %v1438_v53 = vmax.f32 %v1432_v30, 0.0  ;;  %v1424_v54 = vadd.f32 %v1423_v50, %v1375_v49  ;;  %v5261_v49 = vld [vmem:[%s6640_s8 + $0x88] sm:$0xff]  }
 0x430   :  { %v1440_v55 = vpack.c.bf16 %v1438_v53, %v1437_v51  ;;  %v1436_v56 = vmax.f32 %v1424_v54, 0.0 }
 0x432   :  { %5004 = vmatpush3.bf16.msra.mxu1 %v1440_v55  ;;  %5012 = vmatpush3.bf16.msra.mxu0 %v1440_v55  ;;  %v1439_v58 = vpack.c.bf16 %v1436_v56, %v1435_v57 }
 0x433   :  { %5005 = vmatprep.subr.bf16.mxu1 %v5876_v27  ;;  %5013 = vmatprep.subr.bf16.mxu0 %v5876_v27 }
 0x436   :  { %5006 = vmatpush3.bf16.msra.mxu1 %v1439_v58  ;;  %5014 = vmatpush3.bf16.msra.mxu0 %v1439_v58 }
 0x437   :  { %5019 = vmatprep.subr.bf16.mxu1 %v5876_v27  ;;  %5027 = vmatprep.subr.bf16.mxu0 %v5876_v27 }
 0x439   :  { %5016 = vmatmul.mubr.msk.bf16.vlgmr.msra.gmra.mxu0 %vm313_vm0, %v4254_v59  ;;  %5008 = vmatmul.mubr.msk.bf16.vlgmr.msra.gmra.mxu1 %vm313_vm0, %v1441_v61  ;;  %v5268_v61 = vld [vmem:[#allocation11 + $0x74] ss:$8 sps:$4 sm:$0xff]  }
 0x43a   :  { %5020 = vmatpush3.bf16.msra.mxu1 %v1440_v55  ;;  %5028 = vmatpush3.bf16.msra.mxu0 %v1440_v55 }
 0x43b   :  { %5021 = vmatprep.subr.bf16.mxu1 %v5876_v27  ;;  %5029 = vmatprep.subr.bf16.mxu0 %v5876_v27 }
 0x43c   :  { %5031 = vmatprep.mubr.msk.bf16.mxu0 %vm5877_vm3, %v5876_v27  ;;  %5023 = vmatprep.mubr.msk.bf16.mxu1 %vm5877_vm3, %v5876_v27 }
 0x43e   :  { %5022 = vmatpush3.bf16.msra.mxu1 %v1439_v58  ;;  %5030 = vmatpush3.bf16.msra.mxu0 %v1439_v58 }
 0x43f   :  { %5035 = vmatprep.subr.bf16.mxu1 %v5876_v27  ;;  %5043 = vmatprep.subr.bf16.mxu0 %v5876_v27 }
 0x441   :  { %5032 = vmatmul.mubr.msk.bf16.vlgmr.msra.gmra.mxu0 %vm313_vm0, %v4258_v62  ;;  %5024 = vmatmul.mubr.msk.bf16.vlgmr.msra.gmra.mxu1 %vm313_vm0, %v4256_v63 }
 0x442   :  { %5036 = vmatpush3.bf16.msra.mxu1 %v1440_v55  ;;  %5044 = vmatpush3.bf16.msra.mxu0 %v1440_v55 }
 0x443   :  { %5037 = vmatprep.subr.bf16.mxu1 %v5876_v27  ;;  %5045 = vmatprep.subr.bf16.mxu0 %v5876_v27 }
 0x444   :  { %5047 = vmatprep.mubr.msk.bf16.mxu0 %vm5877_vm3, %v5876_v27  ;;  %5039 = vmatprep.mubr.msk.bf16.mxu1 %vm5877_vm3, %v5876_v27 }
 0x446   :  { %5038 = vmatpush3.bf16.msra.mxu1 %v1439_v58  ;;  %5046 = vmatpush3.bf16.msra.mxu0 %v1439_v58 }
 0x447   :  { %5051 = vmatprep.subr.bf16.mxu1 %v5876_v27  ;;  %5059 = vmatprep.subr.bf16.mxu0 %v5876_v27 }
 0x449   :  { %5048 = vmatmul.mubr.msk.bf16.vlgmr.msra.gmra.mxu0 %vm313_vm0, %v4262_v1  ;;  %5040 = vmatmul.mubr.msk.bf16.vlgmr.msra.gmra.mxu1 %vm313_vm0, %v4260_v2 }
 0x44a   :  { %5052 = vmatpush3.bf16.msra.mxu1 %v1440_v55  ;;  %5060 = vmatpush3.bf16.msra.mxu0 %v1440_v55 }
 0x44b   :  { %5053 = vmatprep.subr.bf16.mxu1 %v5876_v27  ;;  %5061 = vmatprep.subr.bf16.mxu0 %v5876_v27 }
 0x44c   :  { %5063 = vmatprep.mubr.msk.bf16.mxu0 %vm5877_vm3, %v5876_v27  ;;  %5055 = vmatprep.mubr.msk.bf16.mxu1 %vm5877_vm3, %v5876_v27 }
 0x44e   :  { %5054 = vmatpush3.bf16.msra.mxu1 %v1439_v58  ;;  %5062 = vmatpush3.bf16.msra.mxu0 %v1439_v58 }
 0x44f   :  { %5067 = vmatprep.subr.bf16.mxu1 %v5876_v27  ;;  %4680 = vmatprep.subr.bf16.mxu0 %v5230_v6 }
 0x451   :  { %5064 = vmatmul.mubr.msk.bf16.vlgmr.msra.gmra.mxu0 %vm313_vm0, %v4266_v3  ;;  %5056 = vmatmul.mubr.msk.bf16.vlgmr.msra.gmra.mxu1 %vm313_vm0, %v4264_v4 }
 0x452   :  { %5068 = vmatpush3.bf16.msra.mxu1 %v1440_v55  ;;  %5071 = vmatprep.mubr.msk.bf16.mxu1 %vm5877_vm3, %v5876_v27  ;;  %v5264_v55 = vld [vmem:[%s6640_s8 + $0x80] sm:$0xff]  }
 0x453   :  { %5069 = vmatprep.subr.bf16.mxu1 %v5876_v27  ;;  %4681 = vmatpush3.bf16.msra.mxu0 %v5231_v7 }
 0x454   :  { %4682 = vmatprep.subr.bf16.mxu0 %v5232_v8 }
 0x456   :  { %5070 = vmatpush3.bf16.msra.mxu1 %v1439_v58 }
 0x457   :  { %4702 = vmatprep.subr.bf16.mxu1 %v5239_v10  ;;  %4683 = vmatpush3.bf16.msra.mxu0 %v5233_v9 }
 0x458   :  { %4684 = vmatprep.subr.bf16.mxu0 %v5234_v12 }
 0x459   :  { %5072 = vmatmul.mubr.msk.bf16.vlgmr.msra.gmra.mxu1 %vm313_vm0, %v4268_v5 }
 0x45a   :  { %4703 = vmatpush3.bf16.msra.mxu1 %v5241_v11 }
 0x45b   :  { %4704 = vmatprep.subr.bf16.mxu1 %v5243_v60  ;;  %4685 = vmatpush3.bf16.msra.mxu0 %v5235_v14 }
 0x45c   :  { %4686 = vmatprep.subr.bf16.mxu0 %v5236_v16 }
 0x45e   :  { %4705 = vmatpush3.bf16.msra.mxu1 %v5245_v0 }
 0x45f   :  { %4706 = vmatprep.subr.bf16.mxu1 %v5247_v15  ;;  %4687 = vmatpush3.bf16.msra.mxu0 %v5237_v17 }
 0x460   :  { %4688 = vmatprep.subr.bf16.mxu0 %v5238_v18 }
 0x462   :  { %4707 = vmatpush3.bf16.msra.mxu1 %v5249_v21  ;;  %v5265_v21 = vld [vmem:[%s6640_s8 + $0x100] sm:$0xff]  }
 0x463   :  { %4689 = vmatpush3.bf16.msra.mxu0 %v5240_v19  ;;  %4708 = vmatprep.subr.bf16.mxu1 %v5251_v24 }
 0x464   :  { %4690 = vmatprep.subr.bf16.mxu0 %v5242_v20  ;;  %v5256_v20 = vld [vmem:[%s6640_s8 + $0x118] sm:$0xff]  }
 0x466   :  { %4709 = vmatpush3.bf16.msra.mxu1 %v5253_v34 }
 0x467   :  { %4691 = vmatpush3.bf16.msra.mxu0 %v5244_v22  ;;  %4710 = vmatprep.subr.bf16.mxu1 %v5254_v35  ;;  %v5259_v22 = vld [vmem:[%s6640_s8 + $0x110] sm:$0xff]  }
 0x468   :  { %4692 = vmatprep.subr.bf16.mxu0 %v5246_v13  ;;  %v5262_v13 = vld [vmem:[%s6640_s8 + $0x108] sm:$0xff]   ;;  %v5266_v35 = vld [vmem:[#allocation11 + $0x70] ss:$8 sps:$4 sm:$0xff]  }
 0x46a   :  { %4711 = vmatpush3.bf16.msra.mxu1 %v5255_v37  ;;  %v5277_v37 = vld [vmem:[#allocation11 + $0x164] ss:$8 sps:$4 sm:$0xff]  }
 0x46b   :  { %4693 = vmatpush3.bf16.msra.mxu0 %v5248_v25  ;;  %4712 = vmatprep.subr.bf16.mxu1 %v5257_v38  ;;  %v5275_v38 = vld [vmem:[#allocation11 + $0x160] ss:$8 sps:$4 sm:$0xff]  }
 0x46c   :  { %4694 = vmatprep.subr.bf16.mxu0 %v5250_v23 }
 0x46e   :  { %4713 = vmatpush3.bf16.msra.mxu1 %v5258_v42  ;;  %v5278_v42 = vld [vmem:[#allocation11 + $0x50] ss:$8 sps:$4 sm:$0xff]  }
 0x46f   :  { %4695 = vmatpush3.bf16.msra.mxu0 %v5252_v33  ;;  %4714 = vmatprep.subr.bf16.mxu1 %v5260_v46  ;;  %v5284_v46 = vld [vmem:[#allocation11 + $0x40] ss:$8 sps:$4 sm:$0xff]  }
 0x470   :  { %5075 = vmatprep.subr.bf16.mxu0 %v5876_v27 }
 0x472   :  { %4715 = vmatpush3.bf16.msra.mxu1 %v5261_v49  ;;  %v5293_v49 = vld [vmem:[#allocation11 + $0x130] ss:$8 sps:$4 sm:$0xff]  }
 0x473   :  { %4716 = vmatprep.subr.bf16.mxu1 %v5263_v52  ;;  %v5296_v52 = vld [vmem:[#allocation11 + $0x20] ss:$8 sps:$4 sm:$0xff]  }
 0x476   :  { %4717 = vmatpush3.bf16.msra.mxu1 %v5264_v55  ;;  %v5307_v55 = vld [vmem:[#allocation11 + $0x114] ss:$8 sps:$4 sm:$0xff]  }
 0x477   :  { %2718 = vmatprep.subr.bf16.mxu1 %v5268_v61  ;;  %v5313_v61 = vld [vmem:[#allocation11 + $0x104] ss:$8 sps:$4 sm:$0xff]  }
 0x4f9   :  { %v1524_v29 = vpop.f32.mrf.mxu0  ;;  %v6529_v26 = vpop.f32.mrf.mxu1 }
 0x4fb   :  { %v5017_v39 = vpop.f32.mrf.mxu0  ;;  %v5009_v31 = vpop.f32.mrf.mxu1 }
 0x4fd   :  { %v1527_v32 = vpop.f32.mrf.mxu0  ;;  %v1482_v36 = vpop.f32.mrf.mxu1 }
 0x4fe   :  { %v5269_v32 = vld [vmem:[#allocation11 + $0x170] ss:$8 sps:$4 sm:$0xff]   ;;  %v5274_v36 = vld [vmem:[#allocation11 + $0x64] ss:$8 sps:$4 sm:$0xff]  }
 0x4ff   :  { %v5018_v40 = vpop.f32.mrf.mxu0  ;;  %v5010_v41 = vpop.f32.mrf.mxu1 }
 0x500   :  { %v5280_v40 = vld [vmem:[#allocation11 + $0x54] ss:$8 sps:$4 sm:$0xff]  }
 0x501   :  { %v1614_v43 = vpop.f32.mrf.mxu0  ;;  %v1569_v44 = vpop.f32.mrf.mxu1  ;;  %v5283_v41 = vld [vmem:[#allocation11 + $0x154] ss:$8 sps:$4 sm:$0xff]  }
 0x502   :  { %v5174_v45 = vpack.i.bf16 %v1524_v29, %v1614_v43  ;;  %v5271_v29 = vld [vmem:[#allocation11 + $0x174] ss:$8 sps:$4 sm:$0xff]   ;;  %v5281_v43 = vld [vmem:[#allocation11 + $0x150] ss:$8 sps:$4 sm:$0xff]  }
 0x503   :  { %v5033_v47 = vpop.f32.mrf.mxu0  ;;  %v5025_v28 = vpop.f32.mrf.mxu1 }
 0x504   :  { %5175 = vrot.lane.b32.xlu0 %v5174_v45, %s5866_s6  ;;  %v5289_v45 = vld [vmem:[#allocation11 + $0x144] ss:$8 sps:$4 sm:$0xff]   ;;  %v5287_v47 = vld [vmem:[#allocation11 + $0x140] ss:$8 sps:$4 sm:$0xff]   ;;  %v5292_v28 = vld [vmem:[#allocation11 + $0x34] ss:$8 sps:$4 sm:$0xff]  }
 0x505   :  { %v1617_v48 = vpop.f32.mrf.mxu0  ;;  %v1572_v30 = vpop.f32.mrf.mxu1 }
 0x506   :  { %v5295_v48 = vld [vmem:[#allocation11 + $0x134] ss:$8 sps:$4 sm:$0xff]   ;;  %v5290_v30 = vld [vmem:[#allocation11 + $0x30] ss:$8 sps:$4 sm:$0xff]  }
 0x507   :  { %v5034_v50 = vpop.f32.mrf.mxu0  ;;  %v5026_v51 = vpop.f32.mrf.mxu1 }
 0x508   :  { %v5298_v50 = vld [vmem:[#allocation11 + $0x24] ss:$8 sps:$4 sm:$0xff]  }
 0x509   :  { %v1704_v53 = vpop.f32.mrf.mxu0  ;;  %v1659_v54 = vpop.f32.mrf.mxu1  ;;  %v5301_v51 = vld [vmem:[#allocation11 + $0x124] ss:$8 sps:$4 sm:$0xff]  }
 0x50b   :  { %v5049_v56 = vpop.f32.mrf.mxu0  ;;  %v5041_v57 = vpop.f32.mrf.mxu1 }
 0x50c   :  { %v5302_v56 = vld [vmem:[#allocation11 + $0x10] ss:$8 sps:$4 sm:$0xff]  }
 0x50d   :  { %v1707_v58 = vpop.f32.mrf.mxu0  ;;  %v1662_v59 = vpop.f32.mrf.mxu1  ;;  %v5305_v57 = vld [vmem:[#allocation11 + $0x110] ss:$8 sps:$4 sm:$0xff]  }
 0x50e   :  { %v5310_v58 = vld [vmem:[#allocation11 + $0x4] ss:$8 sps:$4 sm:$0xff]   ;;  %v5308_v59 = vld [vmem:[#allocation11] ss:$8 sps:$4 sm:$0xff]  }
 0x50f   :  { %v5050_v62 = vpop.f32.mrf.mxu0  ;;  %v5042_v63 = vpop.f32.mrf.mxu1 }
 0x510   :  { %v5311_v62 = vld [vmem:[#allocation11 + $0x100] ss:$8 sps:$4 sm:$0xff]   ;;  %v5316_v63 = vld [vmem:[#allocation11 + $0xf4] ss:$8 sps:$4 sm:$0xff]  }
 0x511   :  { %v1794_v1 = vpop.f32.mrf.mxu0  ;;  %v1749_v2 = vpop.f32.mrf.mxu1 }
 0x512   :  { %v5179_v3 = vpack.i.bf16 %v1704_v53, %v1794_v1  ;;  %v5299_v53 = vld [vmem:[#allocation11 + $0x120] ss:$8 sps:$4 sm:$0xff]   ;;  %v5314_v1 = vld [vmem:[#allocation11 + $0xf0] ss:$8 sps:$4 sm:$0xff]  }
 0x513   :  { %v5065_v4 = vpop.f32.mrf.mxu0  ;;  %v5057_v5 = vpop.f32.mrf.mxu1 }
 0x514   :  { %5180 = vrot.lane.b32.xlu1 %v5179_v3, %s5866_s6  ;;  %v5317_v3 = vld [vmem:[#allocation11 + $0x1f0] ss:$8 sps:$4 sm:$0xff]   ;;  %v5320_v4 = vld [vmem:[#allocation11 + $0xe0] ss:$8 sps:$4 sm:$0xff]   ;;  %v5322_v5 = vld [vmem:[#allocation11 + $0xe4] ss:$8 sps:$4 sm:$0xff]  }
 0x515   :  { %v1797_v6 = vpop.f32.mrf.mxu0  ;;  %v1752_v7 = vpop.f32.mrf.mxu1 }
 0x516   :  { %v5325_v6 = vld [vmem:[#allocation11 + $0x1e4] ss:$8 sps:$4 sm:$0xff]   ;;  %v5323_v7 = vld [vmem:[#allocation11 + $0x1e0] ss:$8 sps:$4 sm:$0xff]  }
 0x517   :  { %v5066_v8 = vpop.f32.mrf.mxu0  ;;  %v5058_v9 = vpop.f32.mrf.mxu1 }
 0x518   :  { %v5328_v8 = vld [vmem:[#allocation11 + $0xd4] ss:$8 sps:$4 sm:$0xff]  }
 0x519   :  { %v1839_v10 = vpop.f32.mrf.mxu1  ;;  %v5331_v9 = vld [vmem:[#allocation11 + $0x1d4] ss:$8 sps:$4 sm:$0xff]  }
 0x51a   :  { %v1869_v33 = vpack.c.bf16 %v1839_v10, %v1839_v10  ;;  %v5326_v10 = vld [vmem:[#allocation11 + $0xd0] ss:$8 sps:$4 sm:$0xff]  }
 0x51b   :  { %v5073_v11 = vpop.f32.mrf.mxu1 }
 0x51c   :  { %v5329_v11 = vld [vmem:[#allocation11 + $0x1d0] ss:$8 sps:$4 sm:$0xff]  }
 0x51d   :  { %v1842_v12 = vpop.f32.mrf.mxu1 }
 0x51e   :  { %v5334_v12 = vld [vmem:[#allocation11 + $0xc4] ss:$8 sps:$4 sm:$0xff]  }
 0x51f   :  { %v5074_v60 = vpop.f32.mrf.mxu1 }
 0x520   :  { %v5332_v60 = vld [vmem:[#allocation11 + $0xc0] ss:$8 sps:$4 sm:$0xff]  }
 0x576   :  { %v5176_v0 = vpop.permute.xlu0 %5175 }
 0x577   :  { %v5178_v14 = vunpack.i.h.bf16 %v5176_v0  ;;  %v5177_v15 = vunpack.i.l.bf16 %v5176_v0  ;;  %v5337_v0 = vld [vmem:[#allocation11 + $0x1c4] ss:$8 sps:$4 sm:$0xff]  }
 0x579   :  { %v1861_v16 = vsel %vm1152_vm1, %v6529_v26, %v5178_v14  ;;  %v1862_v17 = vsel %vm1152_vm1, %v1569_v44, %v5177_v15  ;;  %v5286_v44 = vld [vmem:[#allocation11 + $0x44] ss:$8 sps:$4 sm:$0xff]   ;;  %v5335_v14 = vld [vmem:[#allocation11 + $0x1c0] ss:$8 sps:$4 sm:$0xff]   ;;  %v5340_v15 = vld [vmem:[#allocation11 + $0xb4] ss:$8 sps:$4 sm:$0xff]  }
 0x57a   :  { %v1865_v18 = vpack.c.bf16 %v1861_v16, %v1861_v16  ;;  %v1866_v19 = vpack.c.bf16 %v1862_v17, %v1862_v17  ;;  %v5338_v16 = vld [vmem:[#allocation11 + $0xb0] ss:$8 sps:$4 sm:$0xff]   ;;  %v5343_v17 = vld [vmem:[#allocation11 + $0x1b4] ss:$8 sps:$4 sm:$0xff]  }
 0x57c   :  { %2200 = vmatprep.mubr.bf16.mxu0 %v1866_v19  ;;  %v5346_v19 = vld [vmem:[#allocation11 + $0xa4] ss:$8 sps:$4 sm:$0xff]  }
 0x57d   :  { %2201 = vmatmul.mubr.bf16.vlgmr.msra.gmra.mxu0 %v1865_v18  ;;  %v5341_v18 = vld [vmem:[#allocation11 + $0x1b0] ss:$8 sps:$4 sm:$0xff]  }
 0x57e   :  { %5076 = vmatpush3.bf16.msra.mxu0 %v5256_v20  ;;  %5083 = vmatprep.mubr.msk.bf16.mxu0 %vm5877_vm3, %v5876_v27  ;;  %v5344_v20 = vld [vmem:[#allocation11 + $0xa0] ss:$8 sps:$4 sm:$0xff]  }
 0x57f   :  { %5077 = vmatprep.subr.bf16.mxu0 %v5876_v27 }
 0x582   :  { %5078 = vmatpush3.bf16.msra.mxu0 %v5259_v22  ;;  %v5349_v22 = vld [vmem:[#allocation11 + $0x1a4] ss:$8 sps:$4 sm:$0xff]  }
 0x583   :  { %5079 = vmatprep.subr.bf16.mxu0 %v5876_v27 }
 0x586   :  { %v5181_v25 = vpop.permute.xlu1 %5180  ;;  %5080 = vmatpush3.bf16.msra.mxu0 %v5262_v13  ;;  %v5347_v13 = vld [vmem:[#allocation11 + $0x1a0] ss:$8 sps:$4 sm:$0xff]  }
 0x587   :  { %v5183_v23 = vunpack.i.h.bf16 %v5181_v25  ;;  %v5182_v24 = vunpack.i.l.bf16 %v5181_v25  ;;  %5081 = vmatprep.subr.bf16.mxu0 %v5876_v27  ;;  %v5272_v27 = vld [vmem:[#allocation11 + $0x60] ss:$8 sps:$4 sm:$0xff]   ;;  %v5350_v25 = vld [vmem:[#allocation11 + $0x90] ss:$8 sps:$4 sm:$0xff]  }
 0x589   :  { %v1863_v26 = vsel %vm1152_vm1, %v1659_v54, %v5183_v23  ;;  %v1864_v34 = vsel %vm1152_vm1, %v1749_v2, %v5182_v24  ;;  %v5304_v54 = vld [vmem:[#allocation11 + $0x14] ss:$8 sps:$4 sm:$0xff]   ;;  %v5353_v23 = vld [vmem:[#allocation11 + $0x190] ss:$8 sps:$4 sm:$0xff]  }
 0x58a   :  { %v1867_v39 = vpack.c.bf16 %v1863_v26, %v1863_v26  ;;  %5082 = vmatpush3.bf16.msra.mxu0 %v5265_v21  ;;  %v1868_v31 = vpack.c.bf16 %v1864_v34, %v1864_v34  ;;  %v5319_v2 = vld [vmem:[#allocation11 + $0x1f4] ss:$8 sps:$4 sm:$0xff]   ;;  %v5361_v26 = vld [vmem:[#allocation11 + $0x184] ss:$8 sps:$4 sm:$0xff]   ;;  %v5359_v34 = vld [vmem:[#allocation11 + $0x180] ss:$8 sps:$4 sm:$0xff]  }
 0x58b   :  { %2759 = vmatprep.subr.bf16.mxu0 %v5271_v29  ;;  %v5352_v21 = vld [vmem:[#allocation11 + $0x94] ss:$8 sps:$4 sm:$0xff]   ;;  %v5358_v29 = vld [vmem:[#allocation11 + $0x84] ss:$8 sps:$4 sm:$0xff]  }
 0x58c   :  { %2240 = vmatprep.mubr.bf16.mxu1 %v1868_v31  ;;  %v5355_v24 = vld [vmem:[#allocation11 + $0x194] ss:$8 sps:$4 sm:$0xff]  }
 0x58d   :  { %2241 = vmatmul.mubr.bf16.vlgmr.msra.gmra.mxu1 %v1867_v39  ;;  %5084 = vmatmul.mubr.msk.bf16.vlgmr.msra.gmra.mxu0 %vm1152_vm1, %v1869_v33  ;;  %v5356_v33 = vld [vmem:[#allocation11 + $0x80] ss:$8 sps:$4 sm:$0xff]  }
 0x58e   :  { %2719 = vmatpush1.bf16.msra.mxu1 %v5266_v35  ;;  %2760 = vmatpush1.bf16.msra.mxu0 %v5269_v32  ;;  %v5364_v39 = vld [vmem:[%s6644_s12 + $0x4] ss:$8 sps:$4 sm:$0xff]  }
 0x58f   :  { %2720 = vmatprep.subr.bf16.mxu1 %v5274_v36  ;;  %2761 = vmatprep.subr.bf16.mxu0 %v5277_v37 }
 0x592   :  { %2721 = vmatpush1.bf16.msra.mxu1 %v5272_v27  ;;  %2762 = vmatpush1.bf16.msra.mxu0 %v5275_v38  ;;  %v5878_v27 = vmov 1935823168  }
 0x593   :  { %2722 = vmatprep.subr.bf16.mxu1 %v5280_v40  ;;  %2763 = vmatprep.subr.bf16.mxu0 %v5283_v41  ;;  %v2290_v38 = vunpack.c.l.s4 %v5878_v27  ;;  %v2292_v40 = vlaneseq  ;;  %v4270_v41 = vld [vmem:[#allocation10] ss:$0 sm:$0xff]  ;;  %v5413_v27 = vld [vmem:[#allocation20 + $0x44] ss:$16 sps:$4 sm:$0xff]  }
 0x596   :  { %2723 = vmatpush1.bf16.msra.mxu1 %v5278_v42  ;;  %2764 = vmatpush1.bf16.msra.mxu0 %v5281_v43 }
 0x597   :  { %2724 = vmatprep.subr.bf16.mxu1 %v5286_v44  ;;  %2765 = vmatprep.subr.bf16.mxu0 %v5289_v45  ;;  %v5879_v44 = vmov 1983009808  }
 0x598   :  { %v2299_v45 = vunpack.c.l.s4 %v5879_v44 }
 0x59a   :  { %2725 = vmatpush1.bf16.msra.mxu1 %v5284_v46  ;;  %2766 = vmatpush1.bf16.msra.mxu0 %v5287_v47 }
 0x59b   :  { %2726 = vmatprep.subr.bf16.mxu1 %v5292_v28  ;;  %2767 = vmatprep.subr.bf16.mxu0 %v5295_v48 }
 0x59e   :  { %2727 = vmatpush1.bf16.msra.mxu1 %v5290_v30  ;;  %2768 = vmatpush1.bf16.msra.mxu0 %v5293_v49  ;;  %v2291_v30 = vunpack.c.0.s8 %v2290_v38  ;;  %v6590_v49 = vshrl.u32 %v2292_v40, 7  ;;  %v5411_v38 = vld [vmem:[#allocation20 + $0x40] ss:$16 sps:$4 sm:$0xff]  }
 0x59f   :  { %2728 = vmatprep.subr.bf16.mxu1 %v5298_v50  ;;  %2769 = vmatprep.subr.bf16.mxu0 %v5301_v51 }
 0x5a0   :  { %v6603_v40 = vsub.s32 0, %v6590_v49 }
 0x5a2   :  { %2729 = vmatpush1.bf16.msra.mxu1 %v5296_v52  ;;  %2770 = vmatpush1.bf16.msra.mxu0 %v5299_v53  ;;  %v2300_v53 = vunpack.c.0.s8 %v2299_v45 }
 0x5a3   :  { %2730 = vmatprep.subr.bf16.mxu1 %v5304_v54  ;;  %2771 = vmatprep.subr.bf16.mxu0 %v5307_v55 }
 0x5a6   :  { %2731 = vmatpush1.bf16.msra.mxu1 %v5302_v56  ;;  %2772 = vmatpush1.bf16.msra.mxu0 %v5305_v57  ;;  %v2294_v57 = vsub.s32 %v2291_v30, %v6590_v49 }
 0x5a7   :  { %2732 = vmatprep.subr.bf16.mxu1 %v5310_v58  ;;  %2773 = vmatprep.subr.bf16.mxu0 %v5313_v61 }
 0x5aa   :  { %2733 = vmatpush1.bf16.msra.mxu1 %v5308_v59  ;;  %2774 = vmatpush1.bf16.msra.mxu0 %v5311_v62  ;;  %v2303_v59 = vsub.s32 %v2300_v53, %v6590_v49 }
 0x5ab   :  { %2734 = vmatprep.subr.bf16.mxu1 %v5316_v63  ;;  %2775 = vmatprep.subr.bf16.mxu0 %v5319_v2 }
 0x5ae   :  { %2735 = vmatpush2.bf16.msra.mxu1 %v5314_v1  ;;  %2776 = vmatpush2.bf16.msra.mxu0 %v5317_v3 }
 0x5af   :  { %2736 = vmatprep.subr.bf16.mxu1 %v5322_v5  ;;  %2777 = vmatprep.subr.bf16.mxu0 %v5325_v6 }
 0x5b2   :  { %2737 = vmatpush2.bf16.msra.mxu1 %v5320_v4  ;;  %2778 = vmatpush2.bf16.msra.mxu0 %v5323_v7  ;;  %v5362_v4 = vld [vmem:[%s6644_s12] ss:$8 sps:$4 sm:$0xff]  }
 0x5b3   :  { %2738 = vmatprep.subr.bf16.mxu1 %v5328_v8  ;;  %2779 = vmatprep.subr.bf16.mxu0 %v5331_v9  ;;  %v5365_v8 = vld [vmem:[#allocation16 + $0x78] sm:$0xff]  }
 0x5b6   :  { %2739 = vmatpush2.bf16.msra.mxu1 %v5326_v10  ;;  %2780 = vmatpush2.bf16.msra.mxu0 %v5329_v11  ;;  %v5880_v10 = vmov 0   ;;  %v2802_v11 = vld [vmem:[%s6667_s30] sm:$0x1] }
 0x5b7   :  { %2740 = vmatprep.subr.bf16.mxu1 %v5334_v12  ;;  %2781 = vmatprep.subr.bf16.mxu0 %v5337_v0  ;;  %v5366_v12 = vld [vmem:[#allocation16 + $0x38] sm:$0xff]   ;;  %v5368_v0 = vld [vmem:[#allocation16 + $0x30] sm:$0xff]  }
 0x5ba   :  { %2741 = vmatpush2.bf16.msra.mxu1 %v5332_v60  ;;  %2782 = vmatpush2.bf16.msra.mxu0 %v5335_v14  ;;  %v5367_v60 = vld [vmem:[#allocation16 + $0x70] sm:$0xff]   ;;  %v5369_v14 = vld [vmem:[#allocation16 + $0x68] sm:$0xff]  }
 0x5bb   :  { %2742 = vmatprep.subr.bf16.mxu1 %v5340_v15  ;;  %2783 = vmatprep.subr.bf16.mxu0 %v5343_v17  ;;  %v5370_v15 = vld [vmem:[#allocation16 + $0x28] sm:$0xff]   ;;  %v5372_v17 = vld [vmem:[#allocation16 + $0x20] sm:$0xff]  }
 0x5be   :  { %2743 = vmatpush2.bf16.msra.mxu1 %v5338_v16  ;;  %2784 = vmatpush2.bf16.msra.mxu0 %v5341_v18  ;;  %v5371_v16 = vld [vmem:[#allocation16 + $0x60] sm:$0xff]   ;;  %v5373_v18 = vld [vmem:[#allocation16 + $0x58] sm:$0xff]  }
 0x5bf   :  { %2744 = vmatprep.subr.bf16.mxu1 %v5346_v19  ;;  %2785 = vmatprep.subr.bf16.mxu0 %v5349_v22  ;;  %v5374_v19 = vld [vmem:[#allocation16 + $0x18] sm:$0xff]   ;;  %v5376_v22 = vld [vmem:[#allocation16 + $0x10] sm:$0xff]  }
 0x5c2   :  { %2745 = vmatpush2.bf16.msra.mxu1 %v5344_v20  ;;  %2786 = vmatpush2.bf16.msra.mxu0 %v5347_v13  ;;  %v5375_v20 = vld [vmem:[#allocation16 + $0x50] sm:$0xff]   ;;  %v5377_v13 = vld [vmem:[#allocation16 + $0x48] sm:$0xff]  }
 0x5c3   :  { %2746 = vmatprep.subr.bf16.mxu1 %v5352_v21  ;;  %2787 = vmatprep.subr.bf16.mxu0 %v5355_v24  ;;  %v5379_v21 = vld [vmem:[#allocation16 + $0x40] sm:$0xff]  }
 0x5c4   :  { %v5381_v24 = vld [vmem:[#allocation20 + $0xe0] ss:$16 sps:$4 sm:$0xff]  }
 0x5c6   :  { %2747 = vmatpush2.bf16.msra.mxu1 %v5350_v25  ;;  %2788 = vmatpush2.bf16.msra.mxu0 %v5353_v23  ;;  %v5378_v25 = vld [vmem:[#allocation16 + $0x8] sm:$0xff]   ;;  %v5380_v23 = vld [vmem:[#allocation16] sm:$0xff]  }
 0x5c7   :  { %2748 = vmatprep.subr.bf16.mxu1 %v5358_v29  ;;  %2789 = vmatprep.subr.bf16.mxu0 %v5361_v26  ;;  %v5383_v29 = vld [vmem:[#allocation20 + $0xe4] ss:$16 sps:$4 sm:$0xff]   ;;  %v5386_v26 = vld [vmem:[#allocation20 + $0xec] ss:$16 sps:$4 sm:$0xff]  }
 0x5ca   :  { %2749 = vmatpush2.bf16.msra.mxu1 %v5356_v33  ;;  %2790 = vmatpush2.bf16.msra.mxu0 %v5359_v34  ;;  %v5389_v33 = vld [vmem:[#allocation20 + $0xc4] ss:$16 sps:$4 sm:$0xff]   ;;  %v5387_v34 = vld [vmem:[#allocation20 + $0xc0] ss:$16 sps:$4 sm:$0xff]  }
 0x5cb   :  { %2845 = vmatprep.subr.bf16.mxu1 %v5364_v39  ;;  %3311 = vmatprep.subr.bf16.mxu0 %v5383_v29  ;;  %v5395_v39 = vld [vmem:[#allocation20 + $0xa4] ss:$16 sps:$4 sm:$0xff]  }
 0x63d   :  { %v4696_v31 = vpop.f32.mrf.mxu0 }
 0x63f   :  { %v4697_v35 = vpop.f32.mrf.mxu0 }
 0x640   :  { %v4698_v37 = vadd.f32 %v4697_v35, %v4696_v31  ;;  %v5393_v31 = vld [vmem:[#allocation20 + $0xa0] ss:$16 sps:$4 sm:$0xff]   ;;  %v5401_v35 = vld [vmem:[#allocation20 + $0x84] ss:$16 sps:$4 sm:$0xff]  }
 0x641   :  { %v4699_v32 = vpop.f32.mrf.mxu0 }
 0x642   :  { %v2203_v28 = vadd.f32 %v4698_v37, %v4270_v41  ;;  %v5399_v32 = vld [vmem:[#allocation20 + $0x80] ss:$16 sps:$4 sm:$0xff]   ;;  %v2386_v41 = vld [vmem:[#allocation13] sm:$0x3] }
 0x643   :  { %v4700_v36 = vpop.f32.mrf.mxu0  ;;  %v5405_v37 = vld [vmem:[#allocation20 + $0x60] ss:$16 sps:$4 sm:$0xff]  }
 0x644   :  { %v5407_v36 = vld [vmem:[#allocation20 + $0x64] ss:$16 sps:$4 sm:$0xff]  }
 0x64d   :  { %v4718_v42 = vpop.f32.mrf.mxu1  ;;  %v2282_v43 = vpop.f32.mrf.mxu0 }
 0x64f   :  { %v4719_v46 = vpop.f32.mrf.mxu1  ;;  %v5085_v47 = vpop.f32.mrf.mxu0 }
 0x650   :  { %v4720_v48 = vadd.f32 %v4719_v46, %v4718_v42  ;;  %v6606_v42 = vsub.s32 1, %v6590_v49 }
 0x651   :  { %v4721_v50 = vpop.f32.mrf.mxu1  ;;  %v2285_v51 = vpop.f32.mrf.mxu0 }
 0x652   :  { %v2243_v52 = vadd.f32 %v4720_v48, %v2203_v28  ;;  %v2395_v44 = vrot.slane %v2386_v41, %v6606_v42  ;;  %v2805_v48 = vld [vmem:[#allocation14] sm:$0x3] }
 0x653   :  { %v4722_v54 = vpop.f32.mrf.mxu1  ;;  %v5086_v55 = vpop.f32.mrf.mxu0 }
 0x654   :  { %v2283_v56 = vadd.f32 %v2282_v43, %v2243_v52  ;;  %v2391_v43 = vrot.slane %v2386_v41, %v6603_v40  ;;  %v2810_v54 = vrot.slane %v2805_v48, %v6603_v40  ;;  %v5437_v41 = vld [vmem:[#allocation19 + $0xc4] ss:$16 sps:$4 sm:$0xff]  }
 0x656   :  { %v2288_v58 = vmax.f32 %v2283_v56, 0.0 }
 0x658   :  { %v2295_v61 = vrot.slane %v2288_v58, %v2294_v57  ;;  %v2814_v57 = vrot.slane %v2805_v48, %v6606_v42  ;;  %v5441_v48 = vld [vmem:[#allocation19 + $0xa0] ss:$16 sps:$4 sm:$0xff]  }
 0x65a   :  { %v2304_v62 = vrot.slane %v2295_v61, %v2303_v59  ;;  %v2297_v63 = vcombine.high %v2295_v61, %v2295_v61 }
 0x65c   :  { %v2312_v1 = vcombine.high %v2304_v62, %v2304_v62  ;;  %v2311_v2 = vrot.slane %v2297_v63, %v2303_v59  ;;  %v2318_v6 = vpack.c.bf16 %v2304_v62, %v2304_v62 }
 0x65e   :  { %v2319_v3 = vpack.c.bf16 %v2312_v1, %v2312_v1  ;;  %v2313_v5 = vcombine.high %v2311_v2, %v2311_v2  ;;  %v2320_v9 = vpack.c.bf16 %v2311_v2, %v2311_v2 }
 0x660   :  { %2750 = vmatprep.mubr.bf16.mxu1 %v2319_v3  ;;  %v2321_v7 = vpack.c.bf16 %v2313_v5, %v2313_v5 }
 0x661   :  { %2751 = vmatmul.mubr.bf16.vlgmr.msra.gmra.mxu1 %v2318_v6  ;;  %v5384_v6 = vld [vmem:[#allocation20 + $0xe8] ss:$16 sps:$4 sm:$0xff]  }
 0x662   :  { %2791 = vmatprep.mubr.bf16.mxu0 %v2321_v7  ;;  %2846 = vmatpush1.bf16.msra.mxu1 %v5362_v4 }
 0x663   :  { %2792 = vmatmul.mubr.bf16.vlgmr.msra.gmra.mxu0 %v2320_v9  ;;  %2863 = vmatprep.mubr.bf16.mxu1 %v5880_v10  ;;  %v5390_v9 = vld [vmem:[#allocation20 + $0xc8] ss:$16 sps:$4 sm:$0xff]  }
 0x664   :  { %4729 = vmatprep.subr.bf16.mxu1 %v5365_v8  ;;  %3343 = vmatprep.mubr.bf16.mxu0 %v5880_v10  ;;  %v5392_v8 = vld [vmem:[#allocation20 + $0xcc] ss:$16 sps:$4 sm:$0xff]  }
 0x665   :  { %3312 = vmatpush1.bf16.msra.mxu0 %v5381_v24  ;;  %v5434_v24 = vld [vmem:[#allocation19 + $0xec] ss:$16 sps:$4 sm:$0xff]  }
 0x666   :  { %3313 = vmatprep.subr.bf16.mxu0 %v5389_v33 }
 0x669   :  { %4374 = vmatmul.mubr.msk.bf16.vlgmr.msra.gmra.mxu1 %vm2827_vm4, %v2802_v11  ;;  %3314 = vmatpush1.bf16.msra.mxu0 %v5387_v34  ;;  %v5398_v11 = vld [vmem:[#allocation20 + $0xac] ss:$16 sps:$4 sm:$0xff]  }
 0x66a   :  { %4730 = vmatpush3.bf16.msra.mxu1 %v5366_v12  ;;  %3315 = vmatprep.subr.bf16.mxu0 %v5395_v39  ;;  %v5396_v12 = vld [vmem:[#allocation20 + $0xa8] ss:$16 sps:$4 sm:$0xff]  }
 0x66b   :  { %4731 = vmatprep.subr.bf16.mxu1 %v5367_v60  ;;  %v5404_v60 = vld [vmem:[#allocation20 + $0x8c] ss:$16 sps:$4 sm:$0xff]  }
 0x66d   :  { %3316 = vmatpush1.bf16.msra.mxu0 %v5393_v31 }
 0x66e   :  { %4732 = vmatpush3.bf16.msra.mxu1 %v5368_v0  ;;  %3317 = vmatprep.subr.bf16.mxu0 %v5401_v35  ;;  %v5402_v0 = vld [vmem:[#allocation20 + $0x88] ss:$16 sps:$4 sm:$0xff]  }
 0x66f   :  { %4733 = vmatprep.subr.bf16.mxu1 %v5369_v14  ;;  %v5410_v14 = vld [vmem:[#allocation20 + $0x6c] ss:$16 sps:$4 sm:$0xff]  }
 0x671   :  { %3318 = vmatpush1.bf16.msra.mxu0 %v5399_v32 }
 0x672   :  { %4734 = vmatpush3.bf16.msra.mxu1 %v5370_v15  ;;  %3319 = vmatprep.subr.bf16.mxu0 %v5407_v36  ;;  %v5408_v15 = vld [vmem:[#allocation20 + $0x68] ss:$16 sps:$4 sm:$0xff]  }
 0x673   :  { %4735 = vmatprep.subr.bf16.mxu1 %v5371_v16  ;;  %v5416_v16 = vld [vmem:[#allocation20 + $0x4c] ss:$16 sps:$4 sm:$0xff]  }
 0x675   :  { %3320 = vmatpush1.bf16.msra.mxu0 %v5405_v37  ;;  %v5429_v37 = vld [vmem:[#allocation19 + $0xe0] ss:$16 sps:$4 sm:$0xff]  }
 0x676   :  { %4736 = vmatpush3.bf16.msra.mxu1 %v5372_v17  ;;  %3321 = vmatprep.subr.bf16.mxu0 %v5413_v27  ;;  %v5414_v17 = vld [vmem:[#allocation20 + $0x48] ss:$16 sps:$4 sm:$0xff]  }
 0x677   :  { %4737 = vmatprep.subr.bf16.mxu1 %v5373_v18  ;;  %v5419_v18 = vld [vmem:[#allocation20 + $0x24] ss:$16 sps:$4 sm:$0xff]   ;;  %v5432_v27 = vld [vmem:[#allocation19 + $0xe8] ss:$16 sps:$4 sm:$0xff]  }
 0x679   :  { %3322 = vmatpush1.bf16.msra.mxu0 %v5411_v38 }
 0x67a   :  { %4738 = vmatpush3.bf16.msra.mxu1 %v5374_v19  ;;  %v5417_v19 = vld [vmem:[#allocation20 + $0x20] ss:$16 sps:$4 sm:$0xff]   ;;  %3323 = vmatprep.subr.bf16.mxu0 %v5419_v18  ;;  %v5494_v18 = vld [vmem:[#allocation19 + $0x1ac] ss:$16 sps:$4 sm:$0xff]  }
 0x67b   :  { %4739 = vmatprep.subr.bf16.mxu1 %v5375_v20  ;;  %v5420_v20 = vld [vmem:[#allocation20 + $0x28] ss:$16 sps:$4 sm:$0xff]  }
 0x67d   :  { %3324 = vmatpush1.bf16.msra.mxu0 %v5417_v19  ;;  %v5492_v19 = vld [vmem:[#allocation19 + $0x1a8] ss:$16 sps:$4 sm:$0xff]  }
 0x67e   :  { %4740 = vmatpush3.bf16.msra.mxu1 %v5376_v22  ;;  %v5425_v22 = vld [vmem:[#allocation20 + $0x4] ss:$16 sps:$4 sm:$0xff]  }
 0x67f   :  { %4741 = vmatprep.subr.bf16.mxu1 %v5377_v13  ;;  %v5428_v13 = vld [vmem:[#allocation20 + $0xc] ss:$16 sps:$4 sm:$0xff]   ;;  %3325 = vmatprep.subr.bf16.mxu0 %v5425_v22 }
 0x680   :  { %v5500_v22 = vld [vmem:[#allocation19 + $0x18c] ss:$16 sps:$4 sm:$0xff]  }
 0x682   :  { %4742 = vmatpush3.bf16.msra.mxu1 %v5378_v25  ;;  %v5423_v25 = vld [vmem:[#allocation20] ss:$16 sps:$4 sm:$0xff]  }
 0x683   :  { %4743 = vmatprep.subr.bf16.mxu1 %v5379_v21  ;;  %v5426_v21 = vld [vmem:[#allocation20 + $0x8] ss:$16 sps:$4 sm:$0xff]   ;;  %3326 = vmatpush1.bf16.msra.mxu0 %v5423_v25 }
 0x684   :  { %v5498_v25 = vld [vmem:[#allocation19 + $0x188] ss:$16 sps:$4 sm:$0xff]  }
 0x686   :  { %4744 = vmatpush3.bf16.msra.mxu1 %v5380_v23  ;;  %v5431_v23 = vld [vmem:[#allocation19 + $0xe4] ss:$16 sps:$4 sm:$0xff]  }
 0x687   :  { %3352 = vmatprep.subr.bf16.mxu1 %v5386_v26  ;;  %3713 = vmatprep.subr.bf16.mxu0 %v5431_v23  ;;  %v4375_v26 = vld [vmem:[#allocation17] ss:$0 sm:$0xff] }
 0x688   :  { %v5506_v23 = vld [vmem:[#allocation19 + $0x16c] ss:$16 sps:$4 sm:$0xff]  }
 0x721   :  { %v2752_v45 = vpop.f32.mrf.mxu1 }
 0x722   :  { %v2753_v46 = vadd.f32 %v2752_v45, %v2391_v43  ;;  %v5440_v43 = vld [vmem:[#allocation19 + $0xcc] ss:$16 sps:$4 sm:$0xff]   ;;  %v5435_v45 = vld [vmem:[#allocation19 + $0xc0] ss:$16 sps:$4 sm:$0xff]  }
 0x723   :  { %v2754_v47 = vpop.f32.mrf.mxu1  ;;  %v2793_v28 = vpop.f32.mrf.mxu0 }
 0x724   :  { %v2755_v30 = vadd.f32 %v2754_v47, %v2395_v44  ;;  %v6610_v50 = vadd.f32 %v2793_v28, %v2753_v46  ;;  %v5438_v46 = vld [vmem:[#allocation19 + $0xc8] ss:$16 sps:$4 sm:$0xff]   ;;  %v5443_v47 = vld [vmem:[#allocation19 + $0xa4] ss:$16 sps:$4 sm:$0xff]   ;;  %v5446_v28 = vld [vmem:[#allocation19 + $0xac] ss:$16 sps:$4 sm:$0xff]  }
 0x725   :  { %v2756_v51 = vpop.f32.mrf.mxu1  ;;  %v2795_v52 = vpop.f32.mrf.mxu0 }
 0x726   :  { %v6612_v53 = vadd.f32 %v2795_v52, %v2755_v30  ;;  %v5444_v30 = vld [vmem:[#allocation19 + $0xa8] ss:$16 sps:$4 sm:$0xff]   ;;  %v5449_v51 = vld [vmem:[#allocation19 + $0x84] ss:$16 sps:$4 sm:$0xff]   ;;  %v5452_v52 = vld [vmem:[#allocation19 + $0x8c] ss:$16 sps:$4 sm:$0xff]  }
 0x727   :  { %v2757_v55 = vpop.f32.mrf.mxu1  ;;  %v2797_v56 = vpop.f32.mrf.mxu0 }
 0x728   :  { %v2801_v32 = vmax.f32 %v6612_v53, 0.0  ;;  %v5447_v53 = vld [vmem:[#allocation19 + $0x80] ss:$16 sps:$4 sm:$0xff]   ;;  %v5455_v55 = vld [vmem:[#allocation19 + $0x64] ss:$16 sps:$4 sm:$0xff]  }
 0x729   :  { %v2798_v58 = vpop.f32.mrf.mxu0  ;;  %v2865_v59 = vpop.f32.mrf.mxu1  ;;  %v5458_v56 = vld [vmem:[#allocation19 + $0x6c] ss:$16 sps:$4 sm:$0xff]  }
 0x72a   :  { %v2866_v61 = vadd.f32 %v2865_v59, %v2810_v54  ;;  %v3053_v44 = vpack.c.bf16 %v2801_v32, %v2801_v32  ;;  %v5450_v54 = vld [vmem:[#allocation19 + $0x88] ss:$16 sps:$4 sm:$0xff]   ;;  %v5461_v59 = vld [vmem:[#allocation19 + $0x44] ss:$16 sps:$4 sm:$0xff]   ;;  %v5513_v32 = vld [vmem:[#allocation19 + $0x120] ss:$16 sps:$4 sm:$0xff]  }
 0x72b   :  { %v2867_v62 = vpop.f32.mrf.mxu1  ;;  %v5456_v58 = vld [vmem:[#allocation19 + $0x68] ss:$16 sps:$4 sm:$0xff]  }
 0x72c   :  { %v2868_v63 = vadd.f32 %v2867_v62, %v2814_v57  ;;  %v2872_v1 = vmax.f32 %v2866_v61, 0.0  ;;  %v5453_v57 = vld [vmem:[#allocation19 + $0x60] ss:$16 sps:$4 sm:$0xff]   ;;  %v5464_v61 = vld [vmem:[#allocation19 + $0x4c] ss:$16 sps:$4 sm:$0xff]  }
 0x72d   :  { %v2869_v2 = vpop.f32.mrf.mxu1  ;;  %v5459_v62 = vld [vmem:[#allocation19 + $0x40] ss:$16 sps:$4 sm:$0xff]  }
 0x72e   :  { %v2873_v3 = vmax.f32 %v2868_v63, 0.0  ;;  %v2874_v7 = vpack.c.bf16 %v2872_v1, %v2872_v1  ;;  %v5462_v63 = vld [vmem:[#allocation19 + $0x48] ss:$16 sps:$4 sm:$0xff]   ;;  %v5467_v1 = vld [vmem:[#allocation19 + $0x24] ss:$16 sps:$4 sm:$0xff]  }
 0x72f   :  { %v2870_v4 = vpop.f32.mrf.mxu1  ;;  %v5470_v2 = vld [vmem:[#allocation19 + $0x2c] ss:$16 sps:$4 sm:$0xff]  }
 0x730   :  { %v2875_v5 = vpack.c.bf16 %v2873_v3, %v2873_v3  ;;  %v5465_v3 = vld [vmem:[#allocation19 + $0x20] ss:$16 sps:$4 sm:$0xff]   ;;  %v5468_v4 = vld [vmem:[#allocation19 + $0x28] ss:$16 sps:$4 sm:$0xff]  }
 0x732   :  { %3043 = vmatprep.mubr.bf16.mxu1 %v2875_v5  ;;  %v5473_v5 = vld [vmem:[#allocation19 + $0x4] ss:$16 sps:$4 sm:$0xff]  }
 0x733   :  { %3044 = vmatmul.mubr.bf16.vlgmr.msra.gmra.mxu1 %v2874_v7  ;;  %v5471_v7 = vld [vmem:[#allocation19] ss:$16 sps:$4 sm:$0xff]  }
 0x734   :  { %3353 = vmatpush1.bf16.msra.mxu1 %v5384_v6  ;;  %3384 = vmatprep.mubr.bf16.mxu1 %v5880_v10  ;;  %v5422_v10 = vld [vmem:[#allocation20 + $0x2c] ss:$16 sps:$4 sm:$0xff]  }
 0x735   :  { %3354 = vmatprep.subr.bf16.mxu1 %v5392_v8  ;;  %v5476_v6 = vld [vmem:[#allocation19 + $0xc] ss:$16 sps:$4 sm:$0xff]   ;;  %v5474_v8 = vld [vmem:[#allocation19 + $0x8] ss:$16 sps:$4 sm:$0xff]  }
 0x738   :  { %3355 = vmatpush1.bf16.msra.mxu1 %v5390_v9  ;;  %v5479_v9 = vld [vmem:[#allocation19 + $0x1e4] ss:$16 sps:$4 sm:$0xff]  }
 0x739   :  { %3356 = vmatprep.subr.bf16.mxu1 %v5398_v11  ;;  %v5482_v11 = vld [vmem:[#allocation19 + $0x1ec] ss:$16 sps:$4 sm:$0xff]  }
 0x73c   :  { %3357 = vmatpush1.bf16.msra.mxu1 %v5396_v12  ;;  %v5477_v12 = vld [vmem:[#allocation19 + $0x1e0] ss:$16 sps:$4 sm:$0xff]  }
 0x73d   :  { %3358 = vmatprep.subr.bf16.mxu1 %v5404_v60  ;;  %v5480_v60 = vld [vmem:[#allocation19 + $0x1e8] ss:$16 sps:$4 sm:$0xff]  }
 0x740   :  { %3359 = vmatpush1.bf16.msra.mxu1 %v5402_v0  ;;  %v5485_v0 = vld [vmem:[#allocation19 + $0x1c4] ss:$16 sps:$4 sm:$0xff]  }
 0x741   :  { %3360 = vmatprep.subr.bf16.mxu1 %v5410_v14  ;;  %v5488_v14 = vld [vmem:[#allocation19 + $0x1cc] ss:$16 sps:$4 sm:$0xff]  }
 0x744   :  { %3361 = vmatpush1.bf16.msra.mxu1 %v5408_v15  ;;  %v5483_v15 = vld [vmem:[#allocation19 + $0x1c0] ss:$16 sps:$4 sm:$0xff]  }
 0x745   :  { %3362 = vmatprep.subr.bf16.mxu1 %v5416_v16  ;;  %v5486_v16 = vld [vmem:[#allocation19 + $0x1c8] ss:$16 sps:$4 sm:$0xff]  }
 0x748   :  { %3363 = vmatpush1.bf16.msra.mxu1 %v5414_v17  ;;  %v5491_v17 = vld [vmem:[#allocation19 + $0x1a4] ss:$16 sps:$4 sm:$0xff]  }
 0x749   :  { %3364 = vmatprep.subr.bf16.mxu1 %v5422_v10  ;;  %v5489_v10 = vld [vmem:[#allocation19 + $0x1a0] ss:$16 sps:$4 sm:$0xff]  }
 0x74c   :  { %3365 = vmatpush1.bf16.msra.mxu1 %v5420_v20  ;;  %v5497_v20 = vld [vmem:[#allocation19 + $0x184] ss:$16 sps:$4 sm:$0xff]  }
 0x74d   :  { %3366 = vmatprep.subr.bf16.mxu1 %v5428_v13  ;;  %v5495_v13 = vld [vmem:[#allocation19 + $0x180] ss:$16 sps:$4 sm:$0xff]  }
 0x750   :  { %3367 = vmatpush1.bf16.msra.mxu1 %v5426_v21  ;;  %v5503_v21 = vld [vmem:[#allocation19 + $0x164] ss:$16 sps:$4 sm:$0xff]  }
 0x751   :  { %3754 = vmatprep.subr.bf16.mxu1 %v5434_v24  ;;  %v5501_v24 = vld [vmem:[#allocation19 + $0x160] ss:$16 sps:$4 sm:$0xff]  }
 0x7f3   :  { %v4745_v29 = vpop.f32.mrf.mxu1 }
 0x7f5   :  { %v4746_v33 = vpop.f32.mrf.mxu1 }
 0x7f6   :  { %v4747_v34 = vadd.f32 %v4746_v33, %v4745_v29  ;;  %v5504_v29 = vld [vmem:[#allocation19 + $0x168] ss:$16 sps:$4 sm:$0xff]   ;;  %v5512_v33 = vld [vmem:[#allocation19 + $0x14c] ss:$16 sps:$4 sm:$0xff]  }
 0x7f7   :  { %v4748_v39 = vpop.f32.mrf.mxu1 }
 0x7f8   :  { %v3046_v31 = vadd.f32 %v4747_v34, %v4375_v26  ;;  %v5509_v26 = vld [vmem:[#allocation19 + $0x144] ss:$16 sps:$4 sm:$0xff]   ;;  %v5507_v34 = vld [vmem:[#allocation19 + $0x140] ss:$16 sps:$4 sm:$0xff]   ;;  %v5510_v39 = vld [vmem:[#allocation19 + $0x148] ss:$16 sps:$4 sm:$0xff]  }
 0x7f9   :  { %v4749_v35 = vpop.f32.mrf.mxu1 }
 0x7fa   :  { %v3051_v36 = vmax.f32 %v3046_v31, 0.0  ;;  %v5515_v31 = vld [vmem:[#allocation19 + $0x124] ss:$16 sps:$4 sm:$0xff]   ;;  %v5518_v35 = vld [vmem:[#allocation19 + $0x12c] ss:$16 sps:$4 sm:$0xff]  }
 0x7fc   :  { %v3118_v38 = vpack.c.bf16 %v3051_v36, %v3051_v36  ;;  %v5516_v36 = vld [vmem:[#allocation19 + $0x128] ss:$16 sps:$4 sm:$0xff]  }
 0x7fe   :  { %3344 = vmatmul.mubr.bf16.vlgmr.msra.gmra.mxu0 %v3118_v38  ;;  %3385 = vmatmul.mubr.bf16.vlgmr.msra.gmra.mxu1 %v3118_v38  ;;  %v5519_v38 = vld [vmem:[#allocation19 + $0x100] ss:$16 sps:$4 sm:$0xff]  }
 0x7ff   :  { %3714 = vmatpush1.bf16.msra.mxu0 %v5429_v37  ;;  %3755 = vmatpush1.bf16.msra.mxu1 %v5432_v27  ;;  %v5521_v37 = vld [vmem:[#allocation19 + $0x104] ss:$16 sps:$4 sm:$0xff]   ;;  %v5524_v27 = vld [vmem:[#allocation19 + $0x10c] ss:$16 sps:$4 sm:$0xff]  }
 0x800   :  { %3745 = vmatprep.mubr.bf16.mxu0 %v3053_v44  ;;  %3786 = vmatprep.mubr.bf16.mxu1 %v3053_v44 }
 0x801   :  { %3715 = vmatprep.subr.bf16.mxu0 %v5437_v41  ;;  %3756 = vmatprep.subr.bf16.mxu1 %v5440_v43  ;;  %v5522_v41 = vld [vmem:[#allocation19 + $0x108] ss:$16 sps:$4 sm:$0xff]   ;;  %v2800_v43 = vmax.f32 %v6610_v50, 0.0 }
 0x802   :  { %v5533_v50 = vld [vmem:[#allocation22 + $0x68] sm:$0xff]  }
 0x803   :  { %3716 = vmatpush1.bf16.msra.mxu0 %v5435_v45  ;;  %3757 = vmatpush1.bf16.msra.mxu1 %v5438_v46  ;;  %v3052_v44 = vpack.c.bf16 %v2800_v43, %v2800_v43  ;;  %v5525_v45 = vld [vmem:[#allocation22 + $0x78] sm:$0xff]  }
 0x804   :  { %3717 = vmatprep.subr.bf16.mxu0 %v5443_v47  ;;  %3758 = vmatprep.subr.bf16.mxu1 %v5446_v28  ;;  %v5526_v46 = vld [vmem:[#allocation22 + $0xf8] sm:$0xff]  }
 0x805   :  { %v5527_v47 = vld [vmem:[#allocation22 + $0x38] sm:$0xff]  }
 0x806   :  { %v5528_v28 = vld [vmem:[#allocation22 + $0xb8] sm:$0xff]  }
 0x807   :  { %3718 = vmatpush1.bf16.msra.mxu0 %v5441_v48  ;;  %3759 = vmatpush1.bf16.msra.mxu1 %v5444_v30  ;;  %v5529_v48 = vld [vmem:[#allocation22 + $0x70] sm:$0xff]  }
 0x808   :  { %3719 = vmatprep.subr.bf16.mxu0 %v5449_v51  ;;  %3760 = vmatprep.subr.bf16.mxu1 %v5452_v52  ;;  %v5530_v30 = vld [vmem:[#allocation22 + $0xf0] sm:$0xff]  }
 0x809   :  { %v5531_v51 = vld [vmem:[#allocation22 + $0x30] sm:$0xff]  }
 0x80a   :  { %v5532_v52 = vld [vmem:[#allocation22 + $0xb0] sm:$0xff]  }
 0x80b   :  { %3720 = vmatpush1.bf16.msra.mxu0 %v5447_v53  ;;  %3761 = vmatpush1.bf16.msra.mxu1 %v5450_v54  ;;  %v5534_v53 = vld [vmem:[#allocation22 + $0xe8] sm:$0xff]  }
 0x80c   :  { %3721 = vmatprep.subr.bf16.mxu0 %v5455_v55  ;;  %3762 = vmatprep.subr.bf16.mxu1 %v5458_v56  ;;  %v5535_v54 = vld [vmem:[#allocation22 + $0x28] sm:$0xff]   ;;  %v5537_v56 = vld [vmem:[#allocation22 + $0x60] sm:$0xff]  }
 0x80d   :  { %v5536_v55 = vld [vmem:[#allocation22 + $0xa8] sm:$0xff]  }
 0x80f   :  { %3722 = vmatpush1.bf16.msra.mxu0 %v5453_v57  ;;  %3763 = vmatpush1.bf16.msra.mxu1 %v5456_v58  ;;  %v5538_v57 = vld [vmem:[#allocation22 + $0xe0] sm:$0xff]  }
 0x810   :  { %3723 = vmatprep.subr.bf16.mxu0 %v5461_v59  ;;  %3764 = vmatprep.subr.bf16.mxu1 %v5464_v61  ;;  %v5539_v58 = vld [vmem:[#allocation22 + $0x20] sm:$0xff]   ;;  %v5541_v61 = vld [vmem:[#allocation22 + $0x58] sm:$0xff]  }
 0x811   :  { %v5540_v59 = vld [vmem:[#allocation22 + $0xa0] sm:$0xff]  }
 0x813   :  { %3724 = vmatpush1.bf16.msra.mxu0 %v5459_v62  ;;  %3765 = vmatpush1.bf16.msra.mxu1 %v5462_v63  ;;  %v5542_v62 = vld [vmem:[#allocation22 + $0xd8] sm:$0xff]  }
 0x814   :  { %3725 = vmatprep.subr.bf16.mxu0 %v5467_v1  ;;  %3766 = vmatprep.subr.bf16.mxu1 %v5470_v2  ;;  %v5543_v63 = vld [vmem:[#allocation22 + $0x18] sm:$0xff]   ;;  %v5545_v2 = vld [vmem:[#allocation22 + $0x50] sm:$0xff]  }
 0x815   :  { %v5544_v1 = vld [vmem:[#allocation22 + $0x98] sm:$0xff]  }
 0x817   :  { %3726 = vmatpush1.bf16.msra.mxu0 %v5465_v3  ;;  %3767 = vmatpush1.bf16.msra.mxu1 %v5468_v4  ;;  %v5546_v3 = vld [vmem:[#allocation22 + $0xd0] sm:$0xff]  }
 0x818   :  { %3727 = vmatprep.subr.bf16.mxu0 %v5473_v5  ;;  %3768 = vmatprep.subr.bf16.mxu1 %v5476_v6  ;;  %v5547_v4 = vld [vmem:[#allocation22 + $0x10] sm:$0xff]   ;;  %v5549_v6 = vld [vmem:[#allocation22 + $0x48] sm:$0xff]  }
 0x819   :  { %v5548_v5 = vld [vmem:[#allocation22 + $0x90] sm:$0xff]  }
 0x81b   :  { %3728 = vmatpush1.bf16.msra.mxu0 %v5471_v7  ;;  %3769 = vmatpush1.bf16.msra.mxu1 %v5474_v8  ;;  %v5550_v7 = vld [vmem:[#allocation22 + $0xc8] sm:$0xff]  }
 0x81c   :  { %3729 = vmatprep.subr.bf16.mxu0 %v5479_v9  ;;  %3770 = vmatprep.subr.bf16.mxu1 %v5482_v11  ;;  %v5551_v8 = vld [vmem:[#allocation22 + $0x8] sm:$0xff]   ;;  %v5553_v11 = vld [vmem:[#allocation22 + $0x40] sm:$0xff]  }
 0x81d   :  { %v5552_v9 = vld [vmem:[#allocation22 + $0x88] sm:$0xff]  }
 0x81f   :  { %3730 = vmatpush2.bf16.msra.mxu0 %v5477_v12  ;;  %3771 = vmatpush2.bf16.msra.mxu1 %v5480_v60  ;;  %v5554_v12 = vld [vmem:[#allocation22 + $0xc0] sm:$0xff]  }
 0x820   :  { %3731 = vmatprep.subr.bf16.mxu0 %v5485_v0  ;;  %3772 = vmatprep.subr.bf16.mxu1 %v5488_v14  ;;  %v5555_v60 = vld [vmem:[#allocation22] sm:$0xff]  }
 0x821   :  { %v5556_v0 = vld [vmem:[#allocation22 + $0x80] sm:$0xff]  }
 0x823   :  { %3732 = vmatpush2.bf16.msra.mxu0 %v5483_v15  ;;  %3773 = vmatpush2.bf16.msra.mxu1 %v5486_v16 }
 0x824   :  { %3733 = vmatprep.subr.bf16.mxu0 %v5491_v17  ;;  %3774 = vmatprep.subr.bf16.mxu1 %v5494_v18 }
 0x827   :  { %3734 = vmatpush2.bf16.msra.mxu0 %v5489_v10  ;;  %3775 = vmatpush2.bf16.msra.mxu1 %v5492_v19 }
 0x828   :  { %3735 = vmatprep.subr.bf16.mxu0 %v5497_v20  ;;  %3776 = vmatprep.subr.bf16.mxu1 %v5500_v22  ;;  %v3807_v22 = vsub.s32 2, %v6590_v49 }
 0x82b   :  { %3736 = vmatpush2.bf16.msra.mxu0 %v5495_v13  ;;  %3777 = vmatpush2.bf16.msra.mxu1 %v5498_v25  ;;  %v3795_v13 = vld [vmem:[%s6650_s18] sm:$0xf]  ;;  %v3811_v25 = vsub.s32 3, %v6590_v49 }
 0x82c   :  { %3737 = vmatprep.subr.bf16.mxu0 %v5503_v21  ;;  %3778 = vmatprep.subr.bf16.mxu1 %v5506_v23  ;;  %v3800_v21 = vrot.slane %v3795_v13, %v6603_v40  ;;  %v3808_v23 = vrot.slane %v3795_v13, %v3807_v22 }
 0x82f   :  { %3738 = vmatpush2.bf16.msra.mxu0 %v5501_v24  ;;  %3779 = vmatpush2.bf16.msra.mxu1 %v5504_v29 }
 0x830   :  { %3739 = vmatprep.subr.bf16.mxu0 %v5509_v26  ;;  %3780 = vmatprep.subr.bf16.mxu1 %v5512_v33 }
 0x833   :  { %3740 = vmatpush2.bf16.msra.mxu0 %v5507_v34  ;;  %3781 = vmatpush2.bf16.msra.mxu1 %v5510_v39  ;;  %v3804_v34 = vrot.slane %v3795_v13, %v6606_v42  ;;  %v3812_v39 = vrot.slane %v3795_v13, %v3811_v25 }
 0x834   :  { %3741 = vmatprep.subr.bf16.mxu0 %v5515_v31  ;;  %3782 = vmatprep.subr.bf16.mxu1 %v5518_v35 }
 0x837   :  { %3742 = vmatpush2.bf16.msra.mxu0 %v5513_v32  ;;  %3783 = vmatpush2.bf16.msra.mxu1 %v5516_v36 }
 0x838   :  { %3743 = vmatprep.subr.bf16.mxu0 %v5521_v37  ;;  %3784 = vmatprep.subr.bf16.mxu1 %v5524_v27 }
 0x83b   :  { %3744 = vmatpush2.bf16.msra.mxu0 %v5519_v38  ;;  %3785 = vmatpush2.bf16.msra.mxu1 %v5522_v41 }
 0x83c   :  { %4751 = vmatprep.subr.bf16.mxu0 %v5525_v45  ;;  %4773 = vmatprep.subr.bf16.mxu1 %v5526_v46 }
 0x83e   :  { %3746 = vmatmul.mubr.bf16.vlgmr.msra.gmra.mxu0 %v3052_v44  ;;  %3787 = vmatmul.mubr.bf16.vlgmr.msra.gmra.mxu1 %v3052_v44 }
 0x83f   :  { %4752 = vmatpush3.bf16.msra.mxu0 %v5527_v47  ;;  %4774 = vmatpush3.bf16.msra.mxu1 %v5528_v28 }
 0x840   :  { %4753 = vmatprep.subr.bf16.mxu0 %v5529_v48  ;;  %4775 = vmatprep.subr.bf16.mxu1 %v5530_v30 }
 0x843   :  { %4754 = vmatpush3.bf16.msra.mxu0 %v5531_v51  ;;  %4776 = vmatpush3.bf16.msra.mxu1 %v5532_v52 }
 0x844   :  { %4755 = vmatprep.subr.bf16.mxu0 %v5533_v50  ;;  %4777 = vmatprep.subr.bf16.mxu1 %v5534_v53  ;;  %v4488_v53 = vld [vmem:[%s6652_s20] ss:$0 sm:$0xff] }
 0x847   :  { %4756 = vmatpush3.bf16.msra.mxu0 %v5535_v54  ;;  %4778 = vmatpush3.bf16.msra.mxu1 %v5536_v55 }
 0x848   :  { %4757 = vmatprep.subr.bf16.mxu0 %v5537_v56  ;;  %4779 = vmatprep.subr.bf16.mxu1 %v5538_v57 }
 0x84b   :  { %4758 = vmatpush3.bf16.msra.mxu0 %v5539_v58  ;;  %4780 = vmatpush3.bf16.msra.mxu1 %v5540_v59 }
 0x84c   :  { %4759 = vmatprep.subr.bf16.mxu0 %v5541_v61  ;;  %4781 = vmatprep.subr.bf16.mxu1 %v5542_v62 }
 0x84f   :  { %4760 = vmatpush3.bf16.msra.mxu0 %v5543_v63  ;;  %4782 = vmatpush3.bf16.msra.mxu1 %v5544_v1 }
 0x850   :  { %4761 = vmatprep.subr.bf16.mxu0 %v5545_v2  ;;  %4783 = vmatprep.subr.bf16.mxu1 %v5546_v3 }
 0x853   :  { %4762 = vmatpush3.bf16.msra.mxu0 %v5547_v4  ;;  %4784 = vmatpush3.bf16.msra.mxu1 %v5548_v5 }
 0x854   :  { %4763 = vmatprep.subr.bf16.mxu0 %v5549_v6  ;;  %4785 = vmatprep.subr.bf16.mxu1 %v5550_v7 }
 0x857   :  { %4764 = vmatpush3.bf16.msra.mxu0 %v5551_v8  ;;  %4786 = vmatpush3.bf16.msra.mxu1 %v5552_v9 }
 0x858   :  { %4765 = vmatprep.subr.bf16.mxu0 %v5553_v11  ;;  %4787 = vmatprep.subr.bf16.mxu1 %v5554_v12 }
 0x85b   :  { %4766 = vmatpush3.bf16.msra.mxu0 %v5555_v60  ;;  %4788 = vmatpush3.bf16.msra.mxu1 %v5556_v0 }
 0x8be   :  { %v3345_v14 = vpop.f32.mrf.mxu0  ;;  %v3386_v15 = vpop.f32.mrf.mxu1 }
 0x8c0   :  { %v3347_v16 = vpop.f32.mrf.mxu0  ;;  %v3388_v17 = vpop.f32.mrf.mxu1 }
 0x8c2   :  { %v3349_v18 = vpop.f32.mrf.mxu0  ;;  %v3390_v10 = vpop.f32.mrf.mxu1 }
 0x8c4   :  { %v3350_v19 = vpop.f32.mrf.mxu0  ;;  %v3391_v20 = vpop.f32.mrf.mxu1 }
 0x8fe   :  { %v3747_v24 = vpop.f32.mrf.mxu0  ;;  %v3788_v29 = vpop.f32.mrf.mxu1 }
 0x8ff   :  { %v3748_v26 = vadd.f32 %v3747_v24, %v3345_v14  ;;  %v3789_v33 = vadd.f32 %v3788_v29, %v3386_v15 }
 0x900   :  { %v3749_v31 = vpop.f32.mrf.mxu0  ;;  %v3790_v35 = vpop.f32.mrf.mxu1 }
 0x901   :  { %v3817_v32 = vadd.f32 %v3800_v21, %v3748_v26  ;;  %v3819_v36 = vadd.f32 %v3808_v23, %v3789_v33  ;;  %v3750_v37 = vadd.f32 %v3749_v31, %v3347_v16  ;;  %v3791_v27 = vadd.f32 %v3790_v35, %v3388_v17 }
 0x902   :  { %v3751_v38 = vpop.f32.mrf.mxu0  ;;  %v3792_v41 = vpop.f32.mrf.mxu1 }
 0x903   :  { %v3818_v43 = vadd.f32 %v3804_v34, %v3750_v37  ;;  %v3820_v49 = vadd.f32 %v3812_v39, %v3791_v27  ;;  %v3821_v44 = vmax.f32 %v3817_v32, 0.0  ;;  %v3823_v40 = vmax.f32 %v3819_v36, 0.0 }
 0x904   :  { %v3752_v45 = vpop.f32.mrf.mxu0  ;;  %v3793_v46 = vpop.f32.mrf.mxu1 }
 0x905   :  { %v3822_v47 = vmax.f32 %v3818_v43, 0.0  ;;  %v3824_v28 = vmax.f32 %v3820_v49, 0.0  ;;  %v3825_v42 = vpack.c.bf16 %v3821_v44, %v3821_v44  ;;  %v3827_v51 = vpack.c.bf16 %v3823_v40, %v3823_v40 }
 0x907   :  { %v3826_v48 = vpack.c.bf16 %v3822_v47, %v3822_v47  ;;  %v3828_v30 = vpack.c.bf16 %v3824_v28, %v3824_v28 }
 0x909   :  { %4124 = vmatprep.mubr.bf16.mxu0 %v3826_v48  ;;  %4164 = vmatprep.mubr.bf16.mxu1 %v3828_v30 }
 0x90a   :  { %4125 = vmatmul.mubr.bf16.vlgmr.msra.gmra.mxu0 %v3825_v42  ;;  %4165 = vmatmul.mubr.bf16.vlgmr.msra.gmra.mxu1 %v3827_v51 }
 0x9ca   :  { %v4767_v52 = vpop.f32.mrf.mxu0  ;;  %v4789_v50 = vpop.f32.mrf.mxu1 }
 0x9cc   :  { %v4768_v54 = vpop.f32.mrf.mxu0  ;;  %v4790_v55 = vpop.f32.mrf.mxu1 }
 0x9cd   :  { %v4769_v56 = vadd.f32 %v4768_v54, %v4767_v52  ;;  %v4791_v61 = vadd.f32 %v4790_v55, %v4789_v50 }
 0x9ce   :  { %v4770_v57 = vpop.f32.mrf.mxu0  ;;  %v4792_v58 = vpop.f32.mrf.mxu1 }
 0x9cf   :  { %v4127_v59 = vadd.f32 %v4769_v56, %v4488_v53 }
 0x9d0   :  { %v4771_v62 = vpop.f32.mrf.mxu0  ;;  %v4793_v63 = vpop.f32.mrf.mxu1 }
 0x9d1   :  { %v4167_v1 = vadd.f32 %v4791_v61, %v4127_v59 }
 0x9d3   :  { %5557 = vtanh.f32 %v4167_v1 }
 0x9e0   :  { %v5558_v2 = vpop.eup %5557 }
 0x9e1   :  { %4173 = vst [vmem:[#allocation23] sm:$0x3] %v5558_v2 }
 0x9e2   :  { %5830 = shalt.err (!%p5827_p13)
}
 0x9e3   :  { %4183 = dma.vmem_to_hbm [thread:$0]  %s4181_s26, 32, %s6653_s21, [#allocation4]  }
 0x9e4   :  { %5853 = dma.done.wait [#allocation4], 32  }
 0x9e5   :  { %5854 = vsyncadd [#allocation4], 4294967264 }
 0x9e6   :  { %4187 = vsyncpa [#allocation3], 1 }
 0x9e7   :  { %4188 = vsyncpa [#allocation6], 1 }
 0x9e8   :  { %4189 = vsyncpa [#allocation9], 1 }
 0x9e9   :  { %4190 = vsyncpa [#allocation12], 1 }
 0x9ea   :  { %4191 = vsyncpa [#allocation15], 1 }
 0x9eb   :  { %4192 = vsyncpa [#allocation18], 1 }
 0x9ec   :  { %4193 = vsyncpa [#allocation21], 1 }
 0x9ed   :  { %4194 = vsyncpa [#allocation4], 1 }

</bundles_post_ra>
